<compile_context>
chip_gen: v7x
topology: tpu7x:2x2x1
jax: 0.10.0
libtpu: 0.0.40
codegen_flags: <defaults>
</compile_context>

<pallas_src>
import math
import jax
import jax.numpy as jnp
from jax.experimental import pallas as pl
from jax.experimental.pallas import tpu as pltpu

# --- model hyper-parameters (small, consistent with the module) ---
BATCH = 2
SEQ = 16
HIDDEN = 32
NUM_HEADS = 4
HEAD_DIM = HIDDEN // NUM_HEADS
INTERMEDIATE = 64
LN_EPS = 1e-5
ALPHA = 32.0  # CogView PB-Relax alpha (only used in the reference)

# rows of the packed (8, 128) parameter slab
(_ROW_B_QKV, _ROW_B_INTER, _ROW_B_AO, _ROW_B_OUT,
 _ROW_LN1G, _ROW_LN1B, _ROW_LN2G, _ROW_LN2B) = range(8)


def _layernorm(x, gamma, beta):
    mu = jnp.mean(x, axis=-1, keepdims=True)
    var = jnp.mean(jnp.square(x - mu), axis=-1, keepdims=True)
    return (x - mu) * jax.lax.rsqrt(var + LN_EPS) * gamma + beta


def _gelu(x):
    # exact (erf) GELU, matching nn.GELU() used by RobertaIntermediate
    return 0.5 * x * (1.0 + jax.lax.erf(x / jnp.sqrt(2.0).astype(x.dtype)))


def layoutlmv3_layer_kernel(x_ref, bias_ref, wqkv_ref, wmid_ref, wout_ref,
                            slab_ref, out_ref):
    x3 = x_ref[...]                               # (B, S, H)
    x = x3.reshape(BATCH * SEQ, HIDDEN)           # (B*S, H) — layout preserving

    # unpack the packed (8,128) vector slab
    b_qkv   = slab_ref[_ROW_B_QKV:_ROW_B_QKV + 1, :3 * HIDDEN]
    b_inter = slab_ref[_ROW_B_INTER:_ROW_B_INTER + 1, :INTERMEDIATE]
    b_ao    = slab_ref[_ROW_B_AO:_ROW_B_AO + 1, :HIDDEN]
    b_out   = slab_ref[_ROW_B_OUT:_ROW_B_OUT + 1, :HIDDEN]
    ln1_g   = slab_ref[_ROW_LN1G:_ROW_LN1G + 1, :HIDDEN]
    ln1_b   = slab_ref[_ROW_LN1B:_ROW_LN1B + 1, :HIDDEN]
    ln2_g   = slab_ref[_ROW_LN2G:_ROW_LN2G + 1, :HIDDEN]
    ln2_b   = slab_ref[_ROW_LN2B:_ROW_LN2B + 1, :HIDDEN]

    # Fused QKV projection (PyTorch Linear weights pre-transposed to [in, out]).
    # The 1/sqrt(d) query scaling is already folded into the q weight/bias.
    qkv = jnp.dot(x, wqkv_ref[...], preferred_element_type=jnp.float32) + b_qkv
    q = qkv[:, :HIDDEN].reshape(BATCH, SEQ, HIDDEN)
    k = qkv[:, HIDDEN:2 * HIDDEN].reshape(BATCH, SEQ, HIDDEN)
    v = qkv[:, 2 * HIDDEN:3 * HIDDEN].reshape(BATCH, SEQ, HIDDEN)

    # (rel_pos + rel_2d_pos)/sqrt(d) + additive mask, pre-built wrapper-side.
    bias = bias_ref[...]                          # (NH, B, S, S)

    w_ao = wmid_ref[:, :HIDDEN]                   # (H, H)
    w_inter = wmid_ref[:, HIDDEN:HIDDEN + INTERMEDIATE]  # (H, INTERMEDIATE)

    # Static 4-way unroll over heads; each head does batched-over-B einsums
    # and immediately folds its context slice into the attention-output
    # projection (sublane-aligned w_ao row slice -> no lane concat needed).
    attn_acc = None
    for h in range(NUM_HEADS):
        lo = h * HEAD_DIM
        qh = q[:, :, lo:lo + HEAD_DIM]            # (B, S, D)
        kh = k[:, :, lo:lo + HEAD_DIM]
        vh = v[:, :, lo:lo + HEAD_DIM]
        s = jnp.einsum('bqd,bkd->bqk', qh, kh,
                       preferred_element_type=jnp.float32) + bias[h]
        # PB-Relax softmax((s/a - max)*a) == softmax(s - max) exactly in f32
        # (alpha=32 is a power of two); dropout is identity in eval mode.
        m = jnp.max(s, axis=-1, keepdims=True)
        e = jnp.exp(s - m)
        p = e * pl.reciprocal(jnp.sum(e, axis=-1, keepdims=True), approx=True)
        ctx_h = jnp.einsum('bqk,bkd->bqd', p, vh,
                           preferred_element_type=jnp.float32)
        part = jnp.dot(ctx_h.reshape(BATCH * SEQ, HEAD_DIM),
                       w_ao[lo:lo + HEAD_DIM, :],
                       preferred_element_type=jnp.float32)
        attn_acc = part if attn_acc is None else attn_acc + part

    # RobertaSelfOutput: dense + (dropout noop) + LayerNorm(residual)
    attn_out = attn_acc + b_ao
    h1 = _layernorm(attn_out + x, ln1_g, ln1_b)

    # RobertaIntermediate (dense + GELU) and RobertaOutput (dense + LN residual)
    inter = _gelu(jnp.dot(h1, w_inter, preferred_element_type=jnp.float32)
                  + b_inter)
    out = jnp.dot(inter, wout_ref[...], preferred_element_type=jnp.float32) + b_out
    out_ref[...] = _layernorm(out + h1, ln2_g, ln2_b).reshape(BATCH, SEQ, HIDDEN)


def layoutlmv3_layer(hidden, rel_pos, rel_2d_pos, attn_mask, params):
    B, S, H = hidden.shape
    inv_sqrt_d = 1.0 / math.sqrt(HEAD_DIM)

    # fold the 1/sqrt(d) query scale into the q part of the fused QKV weight
    w_qkv = jnp.concatenate([params["wq"] * inv_sqrt_d,
                             params["wk"], params["wv"]], axis=1)      # (H, 3H)
    b_qkv = jnp.concatenate([params["bq"] * inv_sqrt_d,
                             params["bk"], params["bv"]], axis=1)      # (1, 3H)
    w_mid = jnp.concatenate([params["w_attn_out"], params["w_inter"]],
                            axis=1)                                    # (H, H+I)

    # pack all small bias / LayerNorm vectors into one (8,128) slab
    slab = jnp.zeros((8, 128), jnp.float32)
    slab = slab.at[_ROW_B_QKV, :3 * HIDDEN].set(b_qkv[0])
    slab = slab.at[_ROW_B_INTER, :INTERMEDIATE].set(params["b_inter"][0])
    slab = slab.at[_ROW_B_AO, :HIDDEN].set(params["b_attn_out"][0])
    slab = slab.at[_ROW_B_OUT, :HIDDEN].set(params["b_out"][0])
    slab = slab.at[_ROW_LN1G, :HIDDEN].set(params["ln1_g"][0])
    slab = slab.at[_ROW_LN1B, :HIDDEN].set(params["ln1_b"][0])
    slab = slab.at[_ROW_LN2G, :HIDDEN].set(params["ln2_g"][0])
    slab = slab.at[_ROW_LN2B, :HIDDEN].set(params["ln2_b"][0])

    # single pre-combined bias tensor, head-major: (rel+rel2)/sqrt(d) + mask
    bias = (rel_pos + rel_2d_pos) * inv_sqrt_d + attn_mask[:, None, :, :]
    bias = jnp.transpose(bias, (1, 0, 2, 3))       # (NH, B, S, S)

    vmem = pl.BlockSpec(memory_space=pltpu.MemorySpace.VMEM)
    inputs = [hidden, bias, w_qkv, w_mid, params["w_out"], slab]

    return pl.pallas_call(
        layoutlmv3_layer_kernel,
        out_shape=jax.ShapeDtypeStruct((B, S, H), jnp.float32),
        in_specs=[vmem] * len(inputs),
        out_specs=vmem,
        cost_estimate=pl.CostEstimate(flops=600_000, transcendentals=4_500,
                                      bytes_accessed=170_000),
    )(*inputs)


# --- pure-JAX reference for verification (faithful to the PyTorch module) ---
def reference(hidden, rel_pos, rel_2d_pos, attn_mask, p):
    B, S, H = hidden.shape
    q = hidden @ p["wq"] + p["bq"]
    k = hidden @ p["wk"] + p["bk"]
    v = hidden @ p["wv"] + p["bv"]

    def split(t):
        return t.reshape(B, S, NUM_HEADS, HEAD_DIM).transpose(0, 2, 1, 3)

    qh, kh, vh = split(q), split(k), split(v)
    scores = jnp.einsum("bhqd,bhkd->bhqk", qh / math.sqrt(HEAD_DIM), kh)
    scores = scores + (rel_pos + rel_2d_pos) / math.sqrt(HEAD_DIM)
    scores = scores + attn_mask[:, None, :, :]           # (B,1,1,S)
    # CogView PB-Relax softmax (as in the module)
    scaled = scores / ALPHA
    mx = jnp.max(scaled, axis=-1, keepdims=True)
    probs = jax.nn.softmax((scaled - mx) * ALPHA, axis=-1)
    ctx = jnp.einsum("bhqk,bhkd->bhqd", probs, vh)
    ctx = ctx.transpose(0, 2, 1, 3).reshape(B, S, H)

    attn_out = ctx @ p["w_attn_out"] + p["b_attn_out"]
    h1 = _layernorm(attn_out + hidden, p["ln1_g"], p["ln1_b"])
    inter = _gelu(h1 @ p["w_inter"] + p["b_inter"])
    out = inter @ p["w_out"] + p["b_out"]
    return _layernorm(out + h1, p["ln2_g"], p["ln2_b"])


def init_params(key):
    ks = jax.random.split(key, 12)
    n = lambda k, shape, s=0.02: (s * jax.random.normal(k, shape)).astype(jnp.float32)
    return {
        "wq": n(ks[0], (HIDDEN, HIDDEN)), "bq": n(ks[1], (1, HIDDEN)),
        "wk": n(ks[2], (HIDDEN, HIDDEN)), "bk": n(ks[3], (1, HIDDEN)),
        "wv": n(ks[4], (HIDDEN, HIDDEN)), "bv": n(ks[5], (1, HIDDEN)),
        "w_attn_out": n(ks[6], (HIDDEN, HIDDEN)), "b_attn_out": n(ks[7], (1, HIDDEN)),
        "ln1_g": jnp.ones((1, HIDDEN), jnp.float32),
        "ln1_b": jnp.zeros((1, HIDDEN), jnp.float32),
        "w_inter": n(ks[8], (HIDDEN, INTERMEDIATE)), "b_inter": n(ks[9], (1, INTERMEDIATE)),
        "w_out": n(ks[10], (INTERMEDIATE, HIDDEN)), "b_out": n(ks[11], (1, HIDDEN)),
        "ln2_g": jnp.ones((1, HIDDEN), jnp.float32),
        "ln2_b": jnp.zeros((1, HIDDEN), jnp.float32),
    }


if __name__ == "__main__":
    key = jax.random.PRNGKey(0)
    k_x, k_r1, k_r2, k_p = jax.random.split(key, 4)

    hidden = jax.random.normal(k_x, (BATCH, SEQ, HIDDEN), jnp.float32)
    rel_pos = jax.random.normal(k_r1, (BATCH, NUM_HEADS, SEQ, SEQ), jnp.float32)
    rel_2d_pos = jax.random.normal(k_r2, (BATCH, NUM_HEADS, SEQ, SEQ), jnp.float32)

    # additive attention mask: mask out the last 3 key positions of batch 1
    valid = jnp.ones((BATCH, 1, SEQ), jnp.float32)
    valid = valid.at[1, 0, SEQ - 3:].set(0.0)
    attn_mask = (1.0 - valid) * -10000.0

    params = init_params(k_p)

    # TODO(synk): head_mask / cross-attention / past_key_value branches are not
    # exercised (module asserts no decoder / no cross-attention anyway).

    out = layoutlmv3_layer(hidden, rel_pos, rel_2d_pos, attn_mask, params)
    out = jax.block_until_ready(out)

    ref = reference(hidden, rel_pos, rel_2d_pos, attn_mask, params)
    assert out.shape == (BATCH, SEQ, HIDDEN)
    assert jnp.allclose(out, ref, rtol=1e-3, atol=1e-4), \
        f"max err {jnp.max(jnp.abs(out - ref))}"

    print("KERNEL_OK")
</pallas_src>

<mosaic_0001>
module attributes {stable_mosaic.version = 11 : i64} {
  func.func @layoutlmv3_layer_kernel(%arg0: memref<2x16x32xf32, #tpu.memory_space<vmem>>, %arg1: memref<4x2x16x16xf32, #tpu.memory_space<vmem>>, %arg2: memref<32x96xf32, #tpu.memory_space<vmem>>, %arg3: memref<32x96xf32, #tpu.memory_space<vmem>>, %arg4: memref<64x32xf32, #tpu.memory_space<vmem>>, %arg5: memref<8x128xf32, #tpu.memory_space<vmem>>, %arg6: memref<2x16x32xf32, #tpu.memory_space<vmem>>) attributes {dimension_semantics = [], scalar_prefetch = 0 : i64, scratch_operands = 0 : i64, tpu.core_type = #tpu.core_type<tc>} {
    %c0 = arith.constant 0 : index
    %c0_0 = arith.constant 0 : index
    %c0_1 = arith.constant 0 : index
    %0 = vector.load %arg0[%c0, %c0_0, %c0_1] : memref<2x16x32xf32, #tpu.memory_space<vmem>>, vector<2x16x32xf32>
    %1 = vector.shape_cast %0 : vector<2x16x32xf32> to vector<32x32xf32>
    %c0_2 = arith.constant 0 : index
    %c0_3 = arith.constant 0 : index
    %2 = vector.load %arg5[%c0_2, %c0_3] : memref<8x128xf32, #tpu.memory_space<vmem>>, vector<1x96xf32>
    %c1 = arith.constant 1 : index
    %c0_4 = arith.constant 0 : index
    %3 = vector.load %arg5[%c1, %c0_4] : memref<8x128xf32, #tpu.memory_space<vmem>>, vector<1x64xf32>
    %c2 = arith.constant 2 : index
    %c0_5 = arith.constant 0 : index
    %4 = vector.load %arg5[%c2, %c0_5] : memref<8x128xf32, #tpu.memory_space<vmem>>, vector<1x32xf32>
    %c3 = arith.constant 3 : index
    %c0_6 = arith.constant 0 : index
    %5 = vector.load %arg5[%c3, %c0_6] : memref<8x128xf32, #tpu.memory_space<vmem>>, vector<1x32xf32>
    %c4 = arith.constant 4 : index
    %c0_7 = arith.constant 0 : index
    %6 = vector.load %arg5[%c4, %c0_7] : memref<8x128xf32, #tpu.memory_space<vmem>>, vector<1x32xf32>
    %c5 = arith.constant 5 : index
    %c0_8 = arith.constant 0 : index
    %7 = vector.load %arg5[%c5, %c0_8] : memref<8x128xf32, #tpu.memory_space<vmem>>, vector<1x32xf32>
    %c6 = arith.constant 6 : index
    %c0_9 = arith.constant 0 : index
    %8 = vector.load %arg5[%c6, %c0_9] : memref<8x128xf32, #tpu.memory_space<vmem>>, vector<1x32xf32>
    %c7 = arith.constant 7 : index
    %c0_10 = arith.constant 0 : index
    %9 = vector.load %arg5[%c7, %c0_10] : memref<8x128xf32, #tpu.memory_space<vmem>>, vector<1x32xf32>
    %c0_11 = arith.constant 0 : index
    %c0_12 = arith.constant 0 : index
    %10 = vector.load %arg2[%c0_11, %c0_12] : memref<32x96xf32, #tpu.memory_space<vmem>>, vector<32x96xf32>
    %cst = arith.constant dense<0.000000e+00> : vector<32x96xf32>
    %11 = tpu.matmul %1, %10, %cst {dimension_numbers = #tpu.dot_dimension_numbers<[1], [0], [0], [1], [0, 0, 1, 1], [], []>} : vector<32x32xf32>, vector<32x96xf32>, vector<32x96xf32> -> vector<32x96xf32>
    %12 = vector.broadcast %2 : vector<1x96xf32> to vector<32x96xf32>
    %13 = arith.addf %11, %12 : vector<32x96xf32>
    %14 = vector.extract_strided_slice %13 {offsets = [0, 0], sizes = [32, 32], strides = [1, 1]} : vector<32x96xf32> to vector<32x32xf32>
    %15 = vector.shape_cast %14 : vector<32x32xf32> to vector<2x16x32xf32>
    %16 = vector.extract_strided_slice %13 {offsets = [0, 32], sizes = [32, 32], strides = [1, 1]} : vector<32x96xf32> to vector<32x32xf32>
    %17 = vector.shape_cast %16 : vector<32x32xf32> to vector<2x16x32xf32>
    %18 = vector.extract_strided_slice %13 {offsets = [0, 64], sizes = [32, 32], strides = [1, 1]} : vector<32x96xf32> to vector<32x32xf32>
    %19 = vector.shape_cast %18 : vector<32x32xf32> to vector<2x16x32xf32>
    %c0_13 = arith.constant 0 : index
    %c0_14 = arith.constant 0 : index
    %c0_15 = arith.constant 0 : index
    %c0_16 = arith.constant 0 : index
    %20 = vector.load %arg1[%c0_13, %c0_14, %c0_15, %c0_16] : memref<4x2x16x16xf32, #tpu.memory_space<vmem>>, vector<4x2x16x16xf32>
    %c0_17 = arith.constant 0 : index
    %c0_18 = arith.constant 0 : index
    %21 = vector.load %arg3[%c0_17, %c0_18] : memref<32x96xf32, #tpu.memory_space<vmem>>, vector<32x32xf32>
    %c0_19 = arith.constant 0 : index
    %c32 = arith.constant 32 : index
    %22 = vector.load %arg3[%c0_19, %c32] : memref<32x96xf32, #tpu.memory_space<vmem>>, vector<32x64xf32>
    %23 = vector.extract_strided_slice %15 {offsets = [0, 0, 0], sizes = [2, 16, 8], strides = [1, 1, 1]} : vector<2x16x32xf32> to vector<2x16x8xf32>
    %24 = vector.extract_strided_slice %17 {offsets = [0, 0, 0], sizes = [2, 16, 8], strides = [1, 1, 1]} : vector<2x16x32xf32> to vector<2x16x8xf32>
    %25 = vector.extract_strided_slice %19 {offsets = [0, 0, 0], sizes = [2, 16, 8], strides = [1, 1, 1]} : vector<2x16x32xf32> to vector<2x16x8xf32>
    "tpu.trace_start"() <{level = 10 : i32, message = "bqd,bkd->bqk"}> : () -> ()
    %cst_20 = arith.constant dense<0.000000e+00> : vector<2x16x16xf32>
    %26 = tpu.matmul %23, %24, %cst_20 {dimension_numbers = #tpu.dot_dimension_numbers<[2], [2], [1], [1], [0, 0, 0, 1, 1, 1], [0], [0]>} : vector<2x16x8xf32>, vector<2x16x8xf32>, vector<2x16x16xf32> -> vector<2x16x16xf32>
    "tpu.trace_stop"() : () -> ()
    %27 = vector.extract_strided_slice %20 {offsets = [0, 0, 0, 0], sizes = [1, 2, 16, 16], strides = [1, 1, 1, 1]} : vector<4x2x16x16xf32> to vector<1x2x16x16xf32>
    %28 = vector.shape_cast %27 : vector<1x2x16x16xf32> to vector<2x16x16xf32>
    %29 = arith.addf %26, %28 : vector<2x16x16xf32>
    %cst_21 = arith.constant dense<0xFF800000> : vector<2x16xf32>
    %30 = vector.multi_reduction <maximumf>, %29, %cst_21 [2] : vector<2x16x16xf32> to vector<2x16xf32>
    %31 = vector.shape_cast %30 : vector<2x16xf32> to vector<2x16x1xf32>
    %32 = vector.broadcast %31 : vector<2x16x1xf32> to vector<2x16x16xf32>
    %33 = arith.subf %29, %32 : vector<2x16x16xf32>
    %34 = math.exp %33 : vector<2x16x16xf32>
    %cst_22 = arith.constant dense<0.000000e+00> : vector<2x16xf32>
    %35 = vector.multi_reduction <add>, %34, %cst_22 [2] : vector<2x16x16xf32> to vector<2x16xf32>
    %36 = vector.shape_cast %35 : vector<2x16xf32> to vector<2x16x1xf32>
    %37 = tpu.reciprocal %36 {approx = true} : vector<2x16x1xf32> -> vector<2x16x1xf32>
    %38 = vector.broadcast %37 : vector<2x16x1xf32> to vector<2x16x16xf32>
    %39 = arith.mulf %34, %38 : vector<2x16x16xf32>
    "tpu.trace_start"() <{level = 10 : i32, message = "bqk,bkd->bqd"}> : () -> ()
    %cst_23 = arith.constant dense<0.000000e+00> : vector<2x16x8xf32>
    %40 = tpu.matmul %39, %25, %cst_23 {dimension_numbers = #tpu.dot_dimension_numbers<[2], [1], [1], [2], [0, 0, 0, 1, 1, 2], [0], [0]>} : vector<2x16x16xf32>, vector<2x16x8xf32>, vector<2x16x8xf32> -> vector<2x16x8xf32>
    "tpu.trace_stop"() : () -> ()
    %41 = vector.shape_cast %40 : vector<2x16x8xf32> to vector<32x8xf32>
    %42 = vector.extract_strided_slice %21 {offsets = [0, 0], sizes = [8, 32], strides = [1, 1]} : vector<32x32xf32> to vector<8x32xf32>
    %cst_24 = arith.constant dense<0.000000e+00> : vector<32x32xf32>
    %43 = tpu.matmul %41, %42, %cst_24 {dimension_numbers = #tpu.dot_dimension_numbers<[1], [0], [0], [1], [0, 0, 1, 1], [], []>} : vector<32x8xf32>, vector<8x32xf32>, vector<32x32xf32> -> vector<32x32xf32>
    %44 = vector.extract_strided_slice %15 {offsets = [0, 0, 8], sizes = [2, 16, 8], strides = [1, 1, 1]} : vector<2x16x32xf32> to vector<2x16x8xf32>
    %45 = vector.extract_strided_slice %17 {offsets = [0, 0, 8], sizes = [2, 16, 8], strides = [1, 1, 1]} : vector<2x16x32xf32> to vector<2x16x8xf32>
    %46 = vector.extract_strided_slice %19 {offsets = [0, 0, 8], sizes = [2, 16, 8], strides = [1, 1, 1]} : vector<2x16x32xf32> to vector<2x16x8xf32>
    "tpu.trace_start"() <{level = 10 : i32, message = "bqd,bkd->bqk"}> : () -> ()
    %cst_25 = arith.constant dense<0.000000e+00> : vector<2x16x16xf32>
    %47 = tpu.matmul %44, %45, %cst_25 {dimension_numbers = #tpu.dot_dimension_numbers<[2], [2], [1], [1], [0, 0, 0, 1, 1, 1], [0], [0]>} : vector<2x16x8xf32>, vector<2x16x8xf32>, vector<2x16x16xf32> -> vector<2x16x16xf32>
    "tpu.trace_stop"() : () -> ()
    %48 = vector.extract_strided_slice %20 {offsets = [1, 0, 0, 0], sizes = [1, 2, 16, 16], strides = [1, 1, 1, 1]} : vector<4x2x16x16xf32> to vector<1x2x16x16xf32>
    %49 = vector.shape_cast %48 : vector<1x2x16x16xf32> to vector<2x16x16xf32>
    %50 = arith.addf %47, %49 : vector<2x16x16xf32>
    %cst_26 = arith.constant dense<0xFF800000> : vector<2x16xf32>
    %51 = vector.multi_reduction <maximumf>, %50, %cst_26 [2] : vector<2x16x16xf32> to vector<2x16xf32>
    %52 = vector.shape_cast %51 : vector<2x16xf32> to vector<2x16x1xf32>
    %53 = vector.broadcast %52 : vector<2x16x1xf32> to vector<2x16x16xf32>
    %54 = arith.subf %50, %53 : vector<2x16x16xf32>
    %55 = math.exp %54 : vector<2x16x16xf32>
    %cst_27 = arith.constant dense<0.000000e+00> : vector<2x16xf32>
    %56 = vector.multi_reduction <add>, %55, %cst_27 [2] : vector<2x16x16xf32> to vector<2x16xf32>
    %57 = vector.shape_cast %56 : vector<2x16xf32> to vector<2x16x1xf32>
    %58 = tpu.reciprocal %57 {approx = true} : vector<2x16x1xf32> -> vector<2x16x1xf32>
    %59 = vector.broadcast %58 : vector<2x16x1xf32> to vector<2x16x16xf32>
    %60 = arith.mulf %55, %59 : vector<2x16x16xf32>
    "tpu.trace_start"() <{level = 10 : i32, message = "bqk,bkd->bqd"}> : () -> ()
    %cst_28 = arith.constant dense<0.000000e+00> : vector<2x16x8xf32>
    %61 = tpu.matmul %60, %46, %cst_28 {dimension_numbers = #tpu.dot_dimension_numbers<[2], [1], [1], [2], [0, 0, 0, 1, 1, 2], [0], [0]>} : vector<2x16x16xf32>, vector<2x16x8xf32>, vector<2x16x8xf32> -> vector<2x16x8xf32>
    "tpu.trace_stop"() : () -> ()
    %62 = vector.shape_cast %61 : vector<2x16x8xf32> to vector<32x8xf32>
    %63 = vector.extract_strided_slice %21 {offsets = [8, 0], sizes = [8, 32], strides = [1, 1]} : vector<32x32xf32> to vector<8x32xf32>
    %cst_29 = arith.constant dense<0.000000e+00> : vector<32x32xf32>
    %64 = tpu.matmul %62, %63, %cst_29 {dimension_numbers = #tpu.dot_dimension_numbers<[1], [0], [0], [1], [0, 0, 1, 1], [], []>} : vector<32x8xf32>, vector<8x32xf32>, vector<32x32xf32> -> vector<32x32xf32>
    %65 = arith.addf %43, %64 : vector<32x32xf32>
    %66 = vector.extract_strided_slice %15 {offsets = [0, 0, 16], sizes = [2, 16, 8], strides = [1, 1, 1]} : vector<2x16x32xf32> to vector<2x16x8xf32>
    %67 = vector.extract_strided_slice %17 {offsets = [0, 0, 16], sizes = [2, 16, 8], strides = [1, 1, 1]} : vector<2x16x32xf32> to vector<2x16x8xf32>
    %68 = vector.extract_strided_slice %19 {offsets = [0, 0, 16], sizes = [2, 16, 8], strides = [1, 1, 1]} : vector<2x16x32xf32> to vector<2x16x8xf32>
    "tpu.trace_start"() <{level = 10 : i32, message = "bqd,bkd->bqk"}> : () -> ()
    %cst_30 = arith.constant dense<0.000000e+00> : vector<2x16x16xf32>
    %69 = tpu.matmul %66, %67, %cst_30 {dimension_numbers = #tpu.dot_dimension_numbers<[2], [2], [1], [1], [0, 0, 0, 1, 1, 1], [0], [0]>} : vector<2x16x8xf32>, vector<2x16x8xf32>, vector<2x16x16xf32> -> vector<2x16x16xf32>
    "tpu.trace_stop"() : () -> ()
    %70 = vector.extract_strided_slice %20 {offsets = [2, 0, 0, 0], sizes = [1, 2, 16, 16], strides = [1, 1, 1, 1]} : vector<4x2x16x16xf32> to vector<1x2x16x16xf32>
    %71 = vector.shape_cast %70 : vector<1x2x16x16xf32> to vector<2x16x16xf32>
    %72 = arith.addf %69, %71 : vector<2x16x16xf32>
    %cst_31 = arith.constant dense<0xFF800000> : vector<2x16xf32>
    %73 = vector.multi_reduction <maximumf>, %72, %cst_31 [2] : vector<2x16x16xf32> to vector<2x16xf32>
    %74 = vector.shape_cast %73 : vector<2x16xf32> to vector<2x16x1xf32>
    %75 = vector.broadcast %74 : vector<2x16x1xf32> to vector<2x16x16xf32>
    %76 = arith.subf %72, %75 : vector<2x16x16xf32>
    %77 = math.exp %76 : vector<2x16x16xf32>
    %cst_32 = arith.constant dense<0.000000e+00> : vector<2x16xf32>
    %78 = vector.multi_reduction <add>, %77, %cst_32 [2] : vector<2x16x16xf32> to vector<2x16xf32>
    %79 = vector.shape_cast %78 : vector<2x16xf32> to vector<2x16x1xf32>
    %80 = tpu.reciprocal %79 {approx = true} : vector<2x16x1xf32> -> vector<2x16x1xf32>
    %81 = vector.broadcast %80 : vector<2x16x1xf32> to vector<2x16x16xf32>
    %82 = arith.mulf %77, %81 : vector<2x16x16xf32>
    "tpu.trace_start"() <{level = 10 : i32, message = "bqk,bkd->bqd"}> : () -> ()
    %cst_33 = arith.constant dense<0.000000e+00> : vector<2x16x8xf32>
    %83 = tpu.matmul %82, %68, %cst_33 {dimension_numbers = #tpu.dot_dimension_numbers<[2], [1], [1], [2], [0, 0, 0, 1, 1, 2], [0], [0]>} : vector<2x16x16xf32>, vector<2x16x8xf32>, vector<2x16x8xf32> -> vector<2x16x8xf32>
    "tpu.trace_stop"() : () -> ()
    %84 = vector.shape_cast %83 : vector<2x16x8xf32> to vector<32x8xf32>
    %85 = vector.extract_strided_slice %21 {offsets = [16, 0], sizes = [8, 32], strides = [1, 1]} : vector<32x32xf32> to vector<8x32xf32>
    %cst_34 = arith.constant dense<0.000000e+00> : vector<32x32xf32>
    %86 = tpu.matmul %84, %85, %cst_34 {dimension_numbers = #tpu.dot_dimension_numbers<[1], [0], [0], [1], [0, 0, 1, 1], [], []>} : vector<32x8xf32>, vector<8x32xf32>, vector<32x32xf32> -> vector<32x32xf32>
    %87 = arith.addf %65, %86 : vector<32x32xf32>
    %88 = vector.extract_strided_slice %15 {offsets = [0, 0, 24], sizes = [2, 16, 8], strides = [1, 1, 1]} : vector<2x16x32xf32> to vector<2x16x8xf32>
    %89 = vector.extract_strided_slice %17 {offsets = [0, 0, 24], sizes = [2, 16, 8], strides = [1, 1, 1]} : vector<2x16x32xf32> to vector<2x16x8xf32>
    %90 = vector.extract_strided_slice %19 {offsets = [0, 0, 24], sizes = [2, 16, 8], strides = [1, 1, 1]} : vector<2x16x32xf32> to vector<2x16x8xf32>
    "tpu.trace_start"() <{level = 10 : i32, message = "bqd,bkd->bqk"}> : () -> ()
    %cst_35 = arith.constant dense<0.000000e+00> : vector<2x16x16xf32>
    %91 = tpu.matmul %88, %89, %cst_35 {dimension_numbers = #tpu.dot_dimension_numbers<[2], [2], [1], [1], [0, 0, 0, 1, 1, 1], [0], [0]>} : vector<2x16x8xf32>, vector<2x16x8xf32>, vector<2x16x16xf32> -> vector<2x16x16xf32>
    "tpu.trace_stop"() : () -> ()
    %92 = vector.extract_strided_slice %20 {offsets = [3, 0, 0, 0], sizes = [1, 2, 16, 16], strides = [1, 1, 1, 1]} : vector<4x2x16x16xf32> to vector<1x2x16x16xf32>
    %93 = vector.shape_cast %92 : vector<1x2x16x16xf32> to vector<2x16x16xf32>
    %94 = arith.addf %91, %93 : vector<2x16x16xf32>
    %cst_36 = arith.constant dense<0xFF800000> : vector<2x16xf32>
    %95 = vector.multi_reduction <maximumf>, %94, %cst_36 [2] : vector<2x16x16xf32> to vector<2x16xf32>
    %96 = vector.shape_cast %95 : vector<2x16xf32> to vector<2x16x1xf32>
    %97 = vector.broadcast %96 : vector<2x16x1xf32> to vector<2x16x16xf32>
    %98 = arith.subf %94, %97 : vector<2x16x16xf32>
    %99 = math.exp %98 : vector<2x16x16xf32>
    %cst_37 = arith.constant dense<0.000000e+00> : vector<2x16xf32>
    %100 = vector.multi_reduction <add>, %99, %cst_37 [2] : vector<2x16x16xf32> to vector<2x16xf32>
    %101 = vector.shape_cast %100 : vector<2x16xf32> to vector<2x16x1xf32>
    %102 = tpu.reciprocal %101 {approx = true} : vector<2x16x1xf32> -> vector<2x16x1xf32>
    %103 = vector.broadcast %102 : vector<2x16x1xf32> to vector<2x16x16xf32>
    %104 = arith.mulf %99, %103 : vector<2x16x16xf32>
    "tpu.trace_start"() <{level = 10 : i32, message = "bqk,bkd->bqd"}> : () -> ()
    %cst_38 = arith.constant dense<0.000000e+00> : vector<2x16x8xf32>
    %105 = tpu.matmul %104, %90, %cst_38 {dimension_numbers = #tpu.dot_dimension_numbers<[2], [1], [1], [2], [0, 0, 0, 1, 1, 2], [0], [0]>} : vector<2x16x16xf32>, vector<2x16x8xf32>, vector<2x16x8xf32> -> vector<2x16x8xf32>
    "tpu.trace_stop"() : () -> ()
    %106 = vector.shape_cast %105 : vector<2x16x8xf32> to vector<32x8xf32>
    %107 = vector.extract_strided_slice %21 {offsets = [24, 0], sizes = [8, 32], strides = [1, 1]} : vector<32x32xf32> to vector<8x32xf32>
    %cst_39 = arith.constant dense<0.000000e+00> : vector<32x32xf32>
    %108 = tpu.matmul %106, %107, %cst_39 {dimension_numbers = #tpu.dot_dimension_numbers<[1], [0], [0], [1], [0, 0, 1, 1], [], []>} : vector<32x8xf32>, vector<8x32xf32>, vector<32x32xf32> -> vector<32x32xf32>
    %109 = arith.addf %87, %108 : vector<32x32xf32>
    %110 = vector.broadcast %4 : vector<1x32xf32> to vector<32x32xf32>
    %111 = arith.addf %109, %110 : vector<32x32xf32>
    %112 = arith.addf %111, %1 : vector<32x32xf32>
    %cst_40 = arith.constant dense<0.000000e+00> : vector<32xf32>
    %113 = vector.multi_reduction <add>, %112, %cst_40 [1] : vector<32x32xf32> to vector<32xf32>
    %114 = vector.shape_cast %113 : vector<32xf32> to vector<32x1xf32>
    %cst_41 = arith.constant 3.200000e+01 : f32
    %115 = vector.broadcast %cst_41 : f32 to vector<32x1xf32>
    %116 = arith.divf %114, %115 : vector<32x1xf32>
    %117 = vector.broadcast %116 : vector<32x1xf32> to vector<32x32xf32>
    %118 = arith.subf %112, %117 : vector<32x32xf32>
    %119 = arith.mulf %118, %118 : vector<32x32xf32>
    %cst_42 = arith.constant dense<0.000000e+00> : vector<32xf32>
    %120 = vector.multi_reduction <add>, %119, %cst_42 [1] : vector<32x32xf32> to vector<32xf32>
    %121 = vector.shape_cast %120 : vector<32xf32> to vector<32x1xf32>
    %cst_43 = arith.constant 3.200000e+01 : f32
    %122 = vector.broadcast %cst_43 : f32 to vector<32x1xf32>
    %123 = arith.divf %121, %122 : vector<32x1xf32>
    %124 = vector.broadcast %116 : vector<32x1xf32> to vector<32x32xf32>
    %125 = arith.subf %112, %124 : vector<32x32xf32>
    %cst_44 = arith.constant 9.99999974E-6 : f32
    %126 = vector.broadcast %cst_44 : f32 to vector<32x1xf32>
    %127 = arith.addf %123, %126 : vector<32x1xf32>
    %128 = math.rsqrt %127 : vector<32x1xf32>
    %129 = vector.broadcast %128 : vector<32x1xf32> to vector<32x32xf32>
    %130 = arith.mulf %125, %129 : vector<32x32xf32>
    %131 = vector.broadcast %6 : vector<1x32xf32> to vector<32x32xf32>
    %132 = arith.mulf %130, %131 : vector<32x32xf32>
    %133 = vector.broadcast %7 : vector<1x32xf32> to vector<32x32xf32>
    %134 = arith.addf %132, %133 : vector<32x32xf32>
    %cst_45 = arith.constant dense<0.000000e+00> : vector<32x64xf32>
    %135 = tpu.matmul %134, %22, %cst_45 {dimension_numbers = #tpu.dot_dimension_numbers<[1], [0], [0], [1], [0, 0, 1, 1], [], []>} : vector<32x32xf32>, vector<32x64xf32>, vector<32x64xf32> -> vector<32x64xf32>
    %136 = vector.broadcast %3 : vector<1x64xf32> to vector<32x64xf32>
    %137 = arith.addf %135, %136 : vector<32x64xf32>
    %cst_46 = arith.constant 5.000000e-01 : f32
    %138 = vector.broadcast %cst_46 : f32 to vector<32x64xf32>
    %139 = arith.mulf %138, %137 : vector<32x64xf32>
    %cst_47 = arith.constant 2.000000e+00 : f32
    %140 = math.sqrt %cst_47 : f32
    %141 = vector.broadcast %140 : f32 to vector<32x64xf32>
    %142 = arith.divf %137, %141 : vector<32x64xf32>
    %143 = math.erf %142 : vector<32x64xf32>
    %cst_48 = arith.constant 1.000000e+00 : f32
    %144 = vector.broadcast %cst_48 : f32 to vector<32x64xf32>
    %145 = arith.addf %144, %143 : vector<32x64xf32>
    %146 = arith.mulf %139, %145 : vector<32x64xf32>
    %c0_49 = arith.constant 0 : index
    %c0_50 = arith.constant 0 : index
    %147 = vector.load %arg4[%c0_49, %c0_50] : memref<64x32xf32, #tpu.memory_space<vmem>>, vector<64x32xf32>
    %cst_51 = arith.constant dense<0.000000e+00> : vector<32x32xf32>
    %148 = tpu.matmul %146, %147, %cst_51 {dimension_numbers = #tpu.dot_dimension_numbers<[1], [0], [0], [1], [0, 0, 1, 1], [], []>} : vector<32x64xf32>, vector<64x32xf32>, vector<32x32xf32> -> vector<32x32xf32>
    %149 = vector.broadcast %5 : vector<1x32xf32> to vector<32x32xf32>
    %150 = arith.addf %148, %149 : vector<32x32xf32>
    %151 = arith.addf %150, %134 : vector<32x32xf32>
    %cst_52 = arith.constant dense<0.000000e+00> : vector<32xf32>
    %152 = vector.multi_reduction <add>, %151, %cst_52 [1] : vector<32x32xf32> to vector<32xf32>
    %153 = vector.shape_cast %152 : vector<32xf32> to vector<32x1xf32>
    %cst_53 = arith.constant 3.200000e+01 : f32
    %154 = vector.broadcast %cst_53 : f32 to vector<32x1xf32>
    %155 = arith.divf %153, %154 : vector<32x1xf32>
    %156 = vector.broadcast %155 : vector<32x1xf32> to vector<32x32xf32>
    %157 = arith.subf %151, %156 : vector<32x32xf32>
    %158 = arith.mulf %157, %157 : vector<32x32xf32>
    %cst_54 = arith.constant dense<0.000000e+00> : vector<32xf32>
    %159 = vector.multi_reduction <add>, %158, %cst_54 [1] : vector<32x32xf32> to vector<32xf32>
    %160 = vector.shape_cast %159 : vector<32xf32> to vector<32x1xf32>
    %cst_55 = arith.constant 3.200000e+01 : f32
    %161 = vector.broadcast %cst_55 : f32 to vector<32x1xf32>
    %162 = arith.divf %160, %161 : vector<32x1xf32>
    %163 = vector.broadcast %155 : vector<32x1xf32> to vector<32x32xf32>
    %164 = arith.subf %151, %163 : vector<32x32xf32>
    %cst_56 = arith.constant 9.99999974E-6 : f32
    %165 = vector.broadcast %cst_56 : f32 to vector<32x1xf32>
    %166 = arith.addf %162, %165 : vector<32x1xf32>
    %167 = math.rsqrt %166 : vector<32x1xf32>
    %168 = vector.broadcast %167 : vector<32x1xf32> to vector<32x32xf32>
    %169 = arith.mulf %164, %168 : vector<32x32xf32>
    %170 = vector.broadcast %8 : vector<1x32xf32> to vector<32x32xf32>
    %171 = arith.mulf %169, %170 : vector<32x32xf32>
    %172 = vector.broadcast %9 : vector<1x32xf32> to vector<32x32xf32>
    %173 = arith.addf %171, %172 : vector<32x32xf32>
    %174 = vector.shape_cast %173 : vector<32x32xf32> to vector<2x16x32xf32>
    %c0_57 = arith.constant 0 : index
    %c0_58 = arith.constant 0 : index
    %c0_59 = arith.constant 0 : index
    %175 = vector.load %arg6[%c0_57, %c0_58, %c0_59] : memref<2x16x32xf32, #tpu.memory_space<vmem>>, vector<2x16x32xf32>
    tpu.vector_store %arg6[%c0_57, %c0_58, %c0_59], %174 {strides = array<i32>} : memref<2x16x32xf32, #tpu.memory_space<vmem>>, vector<2x16x32xf32>,
    return
  }
}

</mosaic_0001>

<bundles_post_ra>
// kernel: tpu_custom_call.1
= control target key start
LH: loop header
LB: loop body
LE: loop exit
PB: predicated region body
PF: predicated region fallthrough
CT: control target
= control target key end

     0   :  { %11 = vsyncpa [#allocation3], 0  ;;  %s3790_s0 = inlined_call_operand.vmem [shape: f32[2,16,32], index: 0, kind: input, shape index: {}]   ;;  %s3791_s1 = inlined_call_operand.hbm [shape: f32[4,2,16,16], index: 1, kind: input, shape index: {}]   ;;  %s3792_s2 = inlined_call_operand.vmem [shape: f32[32,96], index: 2, kind: input, shape index: {}]   ;;  %s3793_s3 = inlined_call_operand.vmem [shape: f32[32,96], index: 3, kind: input, shape index: {}]   ;;  %s3794_s4 = inlined_call_operand.vmem [shape: f32[64,32], index: 4, kind: input, shape index: {}]   ;;  %s3795_s5 = inlined_call_operand.vmem [shape: f32[8,128], index: 5, kind: input, shape index: {}]   ;;  %s3796_s6 = inlined_call_operand.hbm [shape: f32[2,16,32], index: 6, kind: output, shape index: {}]  }
   0x1   :  { %12 = vsyncpa [#allocation4], 0  ;;  %s3351_s21 = smov [#allocation2]   ;;  %s3303_s25 = scalar_lea.hbm %s3791_s1, 2048 }
   0x2   :  { %s20_s22 = sshll.u32 %s3351_s21, 4  ;;  %p3304_p0 = scmp.ne.s32.totalorder %s3791_s1, %s3303_s25  ;;  %s21_s22 = int_to_ptr.vmem [resolvable:$true] %s20_s22 }
   0x3   :  { %p3307_p1 = scmp.lt.u32.totalorder %s3303_s25, %s3791_s1 }
   0x5   :  { %p3309_p2 = pnand %p3307_p1, %p3304_p0 }
   0x7   :  { %3312 = shalt.err (!%p3309_p2)
}
   0x8   :  { %s3313_s30 = scalar_lea.vmem %s21_s22, 2048  ;;  %p3318_p4 = scmp.lt.s32.totalorder %s21_s22, %s21_s22 }
   0x9   :  { %p3314_p3 = scmp.ne.s32.totalorder %s21_s22, %s3313_s30  ;;  %p3319_p5 = scmp.lt.s32.totalorder %s3313_s30, %s3313_s30 }
   0xb   :  { %p3320_p6 = por %p3319_p5, %p3318_p4 }
   0xd   :  { %p3321_p7 = pnand %p3320_p6, %p3314_p3 }
   0xf   :  { %3324 = shalt.err (!%p3321_p7)
}
  0x10   :  { %s3352_s7 = smov 128   ;;  %s3353_s8 = smov 8  }
  0x11   :  { %26 = dma.hbm_to_vmem [thread:$0]  %s3791_s1, 2048, %s21_s22, [#allocation3], %s3352_s7, %s3352_s7, %s3353_s8  }
  0x12   :  { %3347 = dma.done.wait [#allocation3], 2048  }
  0x13   :  { %3348 = vsyncadd [#allocation3], 4294965248  ;;  %vm58_vm0 = vcmask 261120   ;;  %v50_v0 = vld [vmem:[%s3792_s2] sm:$0xff]  ;;  %v51_v1 = vld [vmem:[%s3792_s2 + $0x8] sm:$0xff]  ;;  %vm182_vm1 = vcmask 64512  }
  0x14   :  { %v52_v2 = vld [vmem:[%s3792_s2 + $0x10] sm:$0xff]  ;;  %v2982_v3 = vpack.c.bf16 %v51_v1, %v50_v0  ;;  %v53_v4 = vld [vmem:[%s3792_s2 + $0x18] sm:$0xff]  ;;  %v38_v5 = vld [vmem:[%s3790_s0] sm:$0xff]  ;;  %s3354_s27 = smov 96   ;;  %vm355_vm3 = vcmask 130048   ;;  %s3355_s28 = smov 64  }
  0x15   :  { %v2986_v6 = vpack.c.bf16 %v53_v4, %v52_v2  ;;  %2796 = vmatprep.mubr.msk.f32.mxu1 %vm58_vm0, %v38_v5  ;;  %v39_v7 = vld [vmem:[%s3790_s0 + $0x8] sm:$0xff]  ;;  %v40_v8 = vld [vmem:[%s3790_s0 + $0x10] sm:$0xff]  ;;  %v41_v9 = vld [vmem:[%s3790_s0 + $0x18] sm:$0xff]  ;;  %s3356_s29 = smov 88   ;;  %s3357_s30 = smov 120   ;;  %vm2401_vm4 = vcmask 523264  }
  0x16   :  { %2983 = vmatprep.subr.bf16.mxu1 %v2982_v3  ;;  %v2592_v10 = vld [vmem:[%s3795_s5] ss:$0 sm:$0xff]  ;;  %vm3473_vm2 = vmpackc.low %vm182_vm1, %vm182_vm1  ;;  %v157_v32 = vld [vmem:[#allocation2 + $0x8] sm:$0xff]  ;;  %s3358_s9 = smov 56   ;;  %s3359_s10 = smov 80  }
  0x17   :  { %2985 = vmatpush3.bf16.msra.mxu1 %v2982_v3  ;;  %v156_v30 = vld [vmem:[#allocation2] sm:$0xff]  ;;  %v158_v35 = vld [vmem:[#allocation2 + $0x10] sm:$0xff]  ;;  %v159_v39 = vld [vmem:[#allocation2 + $0x18] sm:$0xff]  ;;  %s3360_s11 = smov 112   ;;  %s3361_s16 = smov 48  }
  0x18   :  { %2987 = vmatprep.subr.bf16.mxu1 %v2986_v6  ;;  %s3362_s17 = smov 72   ;;  %s3363_s18 = smov 104  }
  0x19   :  { %s3364_s20 = smov 40  }
  0x1b   :  { %2989 = vmatpush3.bf16.msra.mxu1 %v2986_v6 }
  0x1e   :  { %2797 = vmatmul.mubr.msk.f32.vlgmr.msra.gmra.mrb[0].mxu1 %vm58_vm0, %v39_v7 }
  0x1f   :  { %2799 = vmatprep.mubr.msk.f32.mxu1 %vm58_vm0, %v40_v8 }
  0x22   :  { %2800 = vmatmul.mubr.msk.f32.gmra.mrb[2].mxu1 %vm58_vm0, %v41_v9 }
  0xf1   :  { %v2798_v11 = vpop.f32.mrb[0].mxu1 }
  0xf2   :  { %v3447_v12 = vadd.f32 %v2798_v11, %v2592_v10  ;;  %v137_v13 = vpop.f32.mrb[1].mxu1 }
  0xf3   :  { %v3449_v14 = vadd.f32 %v2592_v10, %v137_v13 }
  0xf5   :  { %v2801_v15 = vpop.f32.mrb[2].mxu1  ;;  %2806 = vmatprep.mubr.msk.f32.mxu1 %vm182_vm1, %v3449_v14  ;;  %v3455_v16 = vpack.i.bf16 %v3447_v12, %v3449_v14 }
  0xf6   :  { %v3457_v17 = vadd.f32 %v2801_v15, %v2592_v10  ;;  %v147_v18 = vpop.f32.mrb[3].mxu1 }
  0xf7   :  { %v3459_v19 = vadd.f32 %v2592_v10, %v147_v18  ;;  %3122 = vrot.lane.b32.xlu0 %v3455_v16, %s3354_s27 }
  0xf9   :  { %v3465_v20 = vpack.i.bf16 %v3457_v17, %v3459_v19  ;;  %2813 = vmatprep.mubr.msk.f32.mxu0 %vm182_vm1, %v3459_v19 }
  0xfb   :  { %3127 = vrot.lane.b32.xlu0 %v3465_v20, %s3354_s27 }
 0x169   :  { %v3123_v21 = vpop.permute.xlu0 %3122 }
 0x16a   :  { %v3125_v22 = vunpack.i.h.bf16 %v3123_v21  ;;  %v3124_v23 = vunpack.i.l.bf16 %v3123_v21 }
 0x16c   :  { %v2990_v25 = vpack.c.bf16 %v3125_v22, %v3124_v23 }
 0x16d   :  { %v3128_v26 = vpop.permute.xlu0 %3127 }
 0x16e   :  { %v3130_v27 = vunpack.i.h.bf16 %v3128_v26  ;;  %v3129_v28 = vunpack.i.l.bf16 %v3128_v26  ;;  %2992 = vmatprep.subr.msk.bf16.mxu1 %vm3473_vm2, %v2990_v25 }
 0x16f   :  { %2995 = vmatpush3.bf16.xpose.msk.msra.mxu1 %vm3473_vm2, %v2990_v25 }
 0x170   :  { %v2996_v29 = vpack.c.bf16 %v3130_v27, %v3129_v28 }
 0x172   :  { %2998 = vmatprep.subr.msk.bf16.mxu0 %vm3473_vm2, %v2996_v29 }
 0x173   :  { %3001 = vmatpush3.bf16.xpose.msk.msra.mxu0 %vm3473_vm2, %v2996_v29 }
 0x176   :  { %2807 = vmatmul.mubr.msk.f32.vlgmr.msra.gmra.mrb[4].mxu1 %vm182_vm1, %v3447_v12 }
 0x17a   :  { %2814 = vmatmul.mubr.msk.f32.vlgmr.msra.gmra.mrb[0].mxu0 %vm182_vm1, %v3457_v17 }
 0x249   :  { %v2808_v31 = vpop.f32.mrb[4].mxu1 }
 0x24a   :  { %v257_v33 = vpop.f32.mrb[5].mxu1  ;;  %v263_v36 = vadd.f32 %v2808_v31, %v157_v32 }
 0x24b   :  { %v258_v34 = vadd.f32 %v257_v33, %v156_v30 }
 0x24c   :  { %v359_v44 = vsel %vm355_vm3, %v263_v36, -inf }
 0x24d   :  { %v2815_v37 = vpop.f32.mrb[0].mxu0  ;;  %v356_v38 = vsel %vm355_vm3, %v258_v34, -inf }
 0x24e   :  { %v346_v40 = vpop.f32.mrb[1].mxu0  ;;  %357 = vmax.xlane.f32.xlu1 %v356_v38  ;;  %v352_v42 = vadd.f32 %v2815_v37, %v159_v39 }
 0x24f   :  { %v347_v41 = vadd.f32 %v346_v40, %v158_v35 }
 0x250   :  { %v365_v45 = vsel %vm355_vm3, %v352_v42, -inf }
 0x251   :  { %v362_v43 = vsel %vm355_vm3, %v347_v41, -inf }
 0x252   :  { %363 = vmax.xlane.f32.xlu0 %v362_v43  ;;  %360 = vmax.xlane.f32.xlu1 %v359_v44 }
 0x256   :  { %366 = vmax.xlane.f32.xlu1 %v365_v45 }
 0x267   :  { %3132 = vrot.lane.b32.xlu1 %v3455_v16, %s3355_s28 }
 0x268   :  { %3137 = vrot.lane.b32.xlu0 %v3465_v20, %s3355_s28 }
 0x26b   :  { %3142 = vrot.lane.b32.xlu1 %v3465_v20, %s3356_s29 }
 0x26c   :  { %574 = vrot.lane.b32.xlu0 %v3449_v14, %s3357_s30 }
 0x26f   :  { %665 = vrot.lane.b32.xlu1 %v3459_v19, %s3357_s30 }
 0x2db   :  { %v358_v46 = vpop.xlane.xlu1 %357 }
 0x2dc   :  { %v368_v47 = vsub.f32 %v258_v34, %v358_v46 }
 0x2de   :  { %v372_v52 = vmul.f32 1.442695, %v368_v47  ;;  %v163_v47 = vld [vmem:[#allocation2 + $0x38] sm:$0xff] }
 0x2df   :  { %v364_v48 = vpop.xlane.xlu0 %363  ;;  %v361_v49 = vpop.xlane.xlu1 %360 }
 0x2e0   :  { %v369_v50 = vsub.f32 %v263_v36, %v361_v49  ;;  %v370_v56 = vsub.f32 %v347_v41, %v364_v48  ;;  %v162_v48 = vld [vmem:[#allocation2 + $0x30] sm:$0xff] }
 0x2e2   :  { %v374_v51 = vmul.f32 1.442695, %v369_v50  ;;  %v376_v1 = vmul.f32 1.442695, %v370_v56 }
 0x2e3   :  { %v3138_v53 = vpop.permute.xlu0 %3137  ;;  %v367_v54 = vpop.xlane.xlu1 %366 }
 0x2e4   :  { %v371_v55 = vsub.f32 %v352_v42, %v367_v54  ;;  %3211 = vpow2.f32 %v374_v51  ;;  %v3140_v60 = vunpack.i.h.bf16 %v3138_v53  ;;  %v3139_v61 = vunpack.i.l.bf16 %v3138_v53 }
 0x2e5   :  { %3213 = vpow2.f32 %v372_v52 }
 0x2e6   :  { %v378_v57 = vmul.f32 1.442695, %v371_v55  ;;  %v3006_v2 = vpack.c.bf16 %v3140_v60, %v3139_v61  ;;  %v160_v55 = vld [vmem:[#allocation2 + $0x20] sm:$0xff] }
 0x2e7   :  { %v575_v58 = vpop.permute.xlu0 %574  ;;  %v3133_v59 = vpop.permute.xlu1 %3132 }
 0x2e8   :  { %v3135_v62 = vunpack.i.h.bf16 %v3133_v59  ;;  %v3134_v63 = vunpack.i.l.bf16 %v3133_v59  ;;  %2834 = vmatprep.mubr.msk.f32.mxu0 %vm182_vm1, %v575_v58  ;;  %3215 = vpow2.f32 %v378_v57 }
 0x2e9   :  { %3217 = vpow2.f32 %v376_v1 }
 0x2ea   :  { %v3002_v0 = vpack.c.bf16 %v3135_v62, %v3134_v63 }
 0x2eb   :  { %v3143_v11 = vpop.permute.xlu1 %3142 }
 0x2ec   :  { %3003 = vmatprep.subr.bf16.mxu1 %v3002_v0  ;;  %v3145_v26 = vunpack.i.h.bf16 %v3143_v11  ;;  %v3144_v27 = vunpack.i.l.bf16 %v3143_v11 }
 0x2ed   :  { %3005 = vmatpush3.bf16.msra.mxu1 %v3002_v0 }
 0x2ee   :  { %3007 = vmatprep.subr.bf16.mxu1 %v3006_v2  ;;  %v3212_v3 = vpop.eup %3211  ;;  %v3016_v31 = vpack.c.bf16 %v3145_v26, %v3144_v27 }
 0x2ef   :  { %v383_v4 = vsel %vm355_vm3, %v3212_v3, 0.0  ;;  %v3214_v5 = vpop.eup %3213  ;;  %v666_v13 = vpop.permute.xlu1 %665 }
 0x2f0   :  { %384 = vadd.xlane.f32.xlu1 %v383_v4  ;;  %v380_v6 = vsel %vm355_vm3, %v3214_v5, 0.0 }
 0x2f2   :  { %v3216_v7 = vpop.eup %3215 }
 0x2f3   :  { %v389_v8 = vsel %vm355_vm3, %v3216_v7, 0.0  ;;  %v3218_v9 = vpop.eup %3217 }
 0x2f4   :  { %381 = vadd.xlane.f32.xlu1 %v380_v6  ;;  %v386_v10 = vsel %vm355_vm3, %v3218_v9, 0.0 }
 0x2f8   :  { %390 = vadd.xlane.f32.xlu1 %v389_v8 }
 0x2fc   :  { %387 = vadd.xlane.f32.xlu1 %v386_v10 }
 0x30d   :  { %667 = vrot.lane.b32.xlu1 %v3457_v17, %s3357_s30 }
 0x311   :  { %3147 = vrot.lane.b32.xlu1 %v3455_v16, %s3356_s29 }
 0x315   :  { %576 = vrot.lane.b32.xlu1 %v3447_v12, %s3357_s30 }
 0x37d   :  { %v385_v15 = vpop.xlane.xlu1 %384 }
 0x37e   :  { %3219 = vrcp.f32 %v385_v15 }
 0x381   :  { %v382_v18 = vpop.xlane.xlu1 %381 }
 0x382   :  { %3221 = vrcp.f32 %v382_v18  ;;  %v161_v18 = vld [vmem:[#allocation2 + $0x28] sm:$0xff] }
 0x385   :  { %v391_v21 = vpop.xlane.xlu1 %390 }
 0x386   :  { %3223 = vrcp.f32 %v391_v21 }
 0x388   :  { %v3220_v23 = vpop.eup %3219 }
 0x389   :  { %v388_v22 = vpop.xlane.xlu1 %387  ;;  %v397_v30 = vmul.f32 %v3220_v23, %v3212_v3 }
 0x38a   :  { %3225 = vrcp.f32 %v388_v22 }
 0x38c   :  { %v3222_v25 = vpop.eup %3221 }
 0x38d   :  { %v668_v28 = vpop.permute.xlu1 %667  ;;  %v396_v29 = vmul.f32 %v3222_v25, %v3214_v5 }
 0x38f   :  { %2820 = vmatprep.mubr.msk.f32.mxu1 %vm355_vm3, %v396_v29 }
 0x390   :  { %2821 = vmatmul.mubr.msk.f32.vlgmr.msra.gmra.mrb[6].mxu1 %vm355_vm3, %v397_v30  ;;  %v3224_v35 = vpop.eup %3223 }
 0x391   :  { %3009 = vmatpush3.bf16.msra.mxu1 %v3006_v2  ;;  %v3148_v32 = vpop.permute.xlu1 %3147  ;;  %v399_v39 = vmul.f32 %v3224_v35, %v3216_v7 }
 0x392   :  { %v3150_v33 = vunpack.i.h.bf16 %v3148_v32  ;;  %v3149_v34 = vunpack.i.l.bf16 %v3148_v32  ;;  %3018 = vmatprep.subr.msk.bf16.mxu1 %vm3473_vm2, %v3016_v31 }
 0x394   :  { %v3226_v36 = vpop.eup %3225  ;;  %v3010_v37 = vpack.c.bf16 %v3150_v33, %v3149_v34 }
 0x395   :  { %v398_v38 = vmul.f32 %v3226_v36, %v3218_v9  ;;  %v577_v40 = vpop.permute.xlu1 %576 }
 0x396   :  { %3012 = vmatprep.subr.msk.bf16.mxu0 %vm3473_vm2, %v3010_v37 }
 0x397   :  { %2827 = vmatprep.mubr.msk.f32.mxu1 %vm355_vm3, %v398_v38  ;;  %3015 = vmatpush3.bf16.xpose.msk.msra.mxu0 %vm3473_vm2, %v3010_v37 }
 0x398   :  { %2828 = vmatmul.mubr.msk.f32.vlgmr.msra.gmra.mrb[8].mxu1 %vm355_vm3, %v399_v39 }
 0x399   :  { %2841 = vmatprep.mubr.msk.f32.mxu1 %vm182_vm1, %v666_v13 }
 0x39a   :  { %3021 = vmatpush3.bf16.xpose.msk.msra.mxu1 %vm3473_vm2, %v3016_v31 }
 0x39e   :  { %2835 = vmatmul.mubr.msk.f32.vlgmr.msra.gmra.mrb[2].mxu0 %vm182_vm1, %v577_v40 }
 0x3a1   :  { %2842 = vmatmul.mubr.msk.f32.vlgmr.msra.gmra.mrb[10].mxu1 %vm182_vm1, %v668_v28 }
 0x463   :  { %v3527_v41 = vpop.f32.mrb[6].mxu1 }
 0x464   :  { %v3529_v42 = vpop.f32.mrb[7].mxu1 }
 0x46b   :  { %v3531_v43 = vpop.f32.mrb[8].mxu1 }
 0x46c   :  { %v3533_v44 = vpop.f32.mrb[9].mxu1 }
 0x471   :  { %v2836_v45 = vpop.f32.mrb[2].mxu0 }
 0x472   :  { %v656_v46 = vpop.f32.mrb[3].mxu0  ;;  %v662_v21 = vadd.f32 %v2836_v45, %v161_v18  ;;  %v3580_v18 = vld [vmem:[%s3793_s3 + $0x8] sm:$0xff] }
 0x473   :  { %v657_v56 = vadd.f32 %v656_v46, %v160_v55 }
 0x474   :  { %v2843_v49 = vpop.f32.mrb[10].mxu1  ;;  %v759_v22 = vsel %vm355_vm3, %v662_v21, -inf }
 0x475   :  { %v753_v50 = vadd.f32 %v2843_v49, %v163_v47  ;;  %v747_v51 = vpop.f32.mrb[11].mxu1  ;;  %v756_v57 = vsel %vm355_vm3, %v657_v56, -inf }
 0x476   :  { %v748_v52 = vadd.f32 %v747_v51, %v162_v48 }
 0x477   :  { %v765_v53 = vsel %vm355_vm3, %v753_v50, -inf }
 0x478   :  { %766 = vmax.xlane.f32.xlu1 %v765_v53  ;;  %v762_v54 = vsel %vm355_vm3, %v748_v52, -inf }
 0x479   :  { %763 = vmax.xlane.f32.xlu0 %v762_v54 }
 0x489   :  { %3152 = vrot.lane.b32.xlu1 %v3465_v20, %s3358_s9 }
 0x48d   :  { %3162 = vrot.lane.b32.xlu1 %v3465_v20, %s3359_s10 }
 0x491   :  { %1168 = vrot.lane.b32.xlu1 %v3449_v14, %s3360_s11 }
 0x495   :  { %1259 = vrot.lane.b32.xlu1 %v3459_v19, %s3360_s11 }
 0x4b9   :  { %757 = vmax.xlane.f32.xlu1 %v756_v57 }
 0x505   :  { %v767_v58 = vpop.xlane.xlu1 %766 }
 0x506   :  { %v771_v59 = vsub.f32 %v753_v50, %v767_v58  ;;  %v764_v60 = vpop.xlane.xlu0 %763 }
 0x507   :  { %v770_v61 = vsub.f32 %v748_v52, %v764_v60 }
 0x508   :  { %v778_v62 = vmul.f32 1.442695, %v771_v59 }
 0x509   :  { %v776_v63 = vmul.f32 1.442695, %v770_v61  ;;  %v3153_v0 = vpop.permute.xlu1 %3152 }
 0x50a   :  { %3227 = vpow2.f32 %v778_v62  ;;  %v3155_v1 = vunpack.i.h.bf16 %v3153_v0  ;;  %v3154_v2 = vunpack.i.l.bf16 %v3153_v0  ;;  %v165_v62 = vld [vmem:[#allocation2 + $0x48] sm:$0xff]  ;;  %v164_v0 = vld [vmem:[#allocation2 + $0x40] sm:$0xff] }
 0x50b   :  { %3229 = vpow2.f32 %v776_v63 }
 0x50c   :  { %v3026_v3 = vpack.c.bf16 %v3155_v1, %v3154_v2 }
 0x50d   :  { %v3163_v8 = vpop.permute.xlu1 %3162 }
 0x50e   :  { %3027 = vmatprep.subr.bf16.mxu1 %v3026_v3  ;;  %v3165_v34 = vunpack.i.h.bf16 %v3163_v8  ;;  %v3164_v35 = vunpack.i.l.bf16 %v3163_v8  ;;  %v167_v8 = vld [vmem:[#allocation2 + $0x58] sm:$0xff] }
 0x50f   :  { %3029 = vmatpush3.bf16.msra.mxu1 %v3026_v3 }
 0x510   :  { %v3036_v38 = vpack.c.bf16 %v3165_v34, %v3164_v35 }
 0x511   :  { %v1169_v9 = vpop.permute.xlu1 %1168 }
 0x514   :  { %v3228_v4 = vpop.eup %3227 }
 0x515   :  { %v789_v5 = vsel %vm355_vm3, %v3228_v4, 0.0  ;;  %v3230_v6 = vpop.eup %3229  ;;  %v1260_v10 = vpop.permute.xlu1 %1259 }
 0x516   :  { %790 = vadd.xlane.f32.xlu0 %v789_v5  ;;  %v786_v7 = vsel %vm355_vm3, %v3230_v6, 0.0 }
 0x51a   :  { %787 = vadd.xlane.f32.xlu0 %v786_v7 }
 0x530   :  { %3157 = vrot.lane.b32.xlu0 %v3455_v16, %s3359_s10 }
 0x534   :  { %1170 = vrot.lane.b32.xlu0 %v3447_v12, %s3360_s11 }
 0x538   :  { %1261 = vrot.lane.b32.xlu0 %v3457_v17, %s3360_s11 }
 0x546   :  { %v758_v11 = vpop.xlane.xlu1 %757 }
 0x547   :  { %v768_v13 = vsub.f32 %v657_v56, %v758_v11 }
 0x549   :  { %v772_v15 = vmul.f32 1.442695, %v768_v13 }
 0x54b   :  { %3231 = vpow2.f32 %v772_v15 }
 0x555   :  { %v3232_v23 = vpop.eup %3231 }
 0x556   :  { %v780_v25 = vsel %vm355_vm3, %v3232_v23, 0.0 }
 0x557   :  { %760 = vmax.xlane.f32.xlu0 %v759_v22 }
 0x55b   :  { %781 = vadd.xlane.f32.xlu0 %v780_v25 }
 0x571   :  { %3167 = vrot.lane.b32.xlu0 %v3455_v16, %s3358_s9 }
 0x5a3   :  { %v791_v26 = vpop.xlane.xlu0 %790 }
 0x5a4   :  { %3233 = vrcp.f32 %v791_v26 }
 0x5a7   :  { %v788_v27 = vpop.xlane.xlu0 %787 }
 0x5a8   :  { %3235 = vrcp.f32 %v788_v27 }
 0x5ab   :  { %v3158_v28 = vpop.permute.xlu0 %3157 }
 0x5ac   :  { %v3160_v29 = vunpack.i.h.bf16 %v3158_v28  ;;  %v3159_v30 = vunpack.i.l.bf16 %v3158_v28 }
 0x5ae   :  { %v3030_v31 = vpack.c.bf16 %v3160_v29, %v3159_v30  ;;  %v3234_v32 = vpop.eup %3233 }
 0x5af   :  { %v799_v37 = vmul.f32 %v3234_v32, %v3228_v4  ;;  %v1171_v39 = vpop.permute.xlu0 %1170 }
 0x5b0   :  { %3032 = vmatprep.subr.msk.bf16.mxu1 %vm3473_vm2, %v3030_v31 }
 0x5b2   :  { %v3236_v33 = vpop.eup %3235 }
 0x5b3   :  { %v798_v36 = vmul.f32 %v3236_v33, %v3230_v6  ;;  %v1262_v40 = vpop.permute.xlu0 %1261  ;;  %v166_v6 = vld [vmem:[#allocation2 + $0x50] sm:$0xff] }
 0x5b5   :  { %2855 = vmatprep.mubr.msk.f32.mxu1 %vm355_vm3, %v798_v36 }
 0x5b6   :  { %2856 = vmatmul.mubr.msk.f32.vlgmr.msra.gmra.mrb[12].mxu1 %vm355_vm3, %v799_v37 }
 0x5b7   :  { %3035 = vmatpush3.bf16.xpose.msk.msra.mxu1 %vm3473_vm2, %v3030_v31  ;;  %2878 = vmatprep.mubr.msk.f32.mxu1 %vm182_vm1, %v1169_v9 }
 0x5b8   :  { %3038 = vmatprep.subr.msk.bf16.mxu1 %vm3473_vm2, %v3036_v38 }
 0x5be   :  { %2879 = vmatmul.mubr.msk.f32.vlgmr.msra.gmra.mrb[14].mxu1 %vm182_vm1, %v1171_v39 }
 0x5bf   :  { %3041 = vmatpush3.bf16.xpose.msk.msra.mxu1 %vm3473_vm2, %v3036_v38  ;;  %2885 = vmatprep.mubr.msk.f32.mxu1 %vm182_vm1, %v1260_v10 }
 0x5c6   :  { %2886 = vmatmul.mubr.msk.f32.vlgmr.msra.gmra.mrb[16].mxu1 %vm182_vm1, %v1262_v40 }
 0x5e4   :  { %v761_v45 = vpop.xlane.xlu0 %760 }
 0x5e5   :  { %v769_v46 = vsub.f32 %v662_v21, %v761_v45  ;;  %v3587_v21 = vld [vmem:[%s3793_s3] sm:$0xff] }
 0x5e7   :  { %v774_v47 = vmul.f32 1.442695, %v769_v46 }
 0x5e8   :  { %v782_v48 = vpop.xlane.xlu0 %781 }
 0x5e9   :  { %3237 = vpow2.f32 %v774_v47 }
 0x5ea   :  { %3239 = vrcp.f32 %v782_v48 }
 0x5ec   :  { %v3168_v49 = vpop.permute.xlu0 %3167 }
 0x5ed   :  { %v3170_v50 = vunpack.i.h.bf16 %v3168_v49  ;;  %v3169_v51 = vunpack.i.l.bf16 %v3168_v49 }
 0x5ef   :  { %v3022_v52 = vpack.c.bf16 %v3170_v50, %v3169_v51 }
 0x5f1   :  { %3023 = vmatprep.subr.bf16.mxu0 %v3022_v52 }
 0x5f2   :  { %3025 = vmatpush3.bf16.msra.mxu0 %v3022_v52 }
 0x5f3   :  { %v3238_v53 = vpop.eup %3237  ;;  %2858 = vmatprep.subr.mxu0 %v3580_v18 }
 0x5f4   :  { %v3240_v54 = vpop.eup %3239  ;;  %v783_v55 = vsel %vm355_vm3, %v3238_v53, 0.0 }
 0x5f5   :  { %784 = vadd.xlane.f32.xlu1 %v783_v55  ;;  %v796_v56 = vmul.f32 %v3240_v54, %v3232_v23 }
 0x5f7   :  { %2848 = vmatprep.mubr.msk.f32.mxu0 %vm355_vm3, %v796_v56  ;;  %v3627_v56 = vld [vmem:[%s3793_s3 + $0x10] sm:$0xff] }
 0x682   :  { %v785_v57 = vpop.xlane.xlu1 %784 }
 0x683   :  { %3241 = vrcp.f32 %v785_v57 }
 0x689   :  { %v3568_v58 = vpop.f32.mrb[12].mxu1 }
 0x68a   :  { %v3570_v59 = vpop.f32.mrb[13].mxu1 }
 0x68d   :  { %v3242_v60 = vpop.eup %3241 }
 0x68e   :  { %v797_v61 = vmul.f32 %v3242_v60, %v3238_v53 }
 0x690   :  { %2849 = vmatmul.mubr.msk.f32.vlgmr.msra.gmra.mrb[4].mxu0 %vm355_vm3, %v797_v61 }
 0x691   :  { %v2880_v63 = vpop.f32.mrb[14].mxu1  ;;  %2859 = vmatpush3.msra.mxu0 %v3580_v18 }
 0x692   :  { %v1256_v1 = vadd.f32 %v2880_v63, %v165_v62  ;;  %v1250_v2 = vpop.f32.mrb[15].mxu1  ;;  %2866 = vmatprep.subr.mxu0 %v3587_v21 }
 0x693   :  { %v1251_v3 = vadd.f32 %v1250_v2, %v164_v0 }
 0x694   :  { %v1353_v4 = vsel %vm355_vm3, %v1256_v1, -inf }
 0x695   :  { %1354 = vmax.xlane.f32.xlu1 %v1353_v4  ;;  %v1350_v5 = vsel %vm355_vm3, %v1251_v3, -inf }
 0x699   :  { %v2887_v7 = vpop.f32.mrb[16].mxu1  ;;  %1351 = vmax.xlane.f32.xlu1 %v1350_v5 }
 0x69a   :  { %v1341_v9 = vpop.f32.mrb[17].mxu1  ;;  %v1347_v11 = vadd.f32 %v2887_v7, %v167_v8 }
 0x69b   :  { %v1342_v10 = vadd.f32 %v1341_v9, %v166_v6 }
 0x69c   :  { %v1359_v15 = vsel %vm355_vm3, %v1347_v11, -inf }
 0x69d   :  { %v1356_v13 = vsel %vm355_vm3, %v1342_v10, -inf }
 0x69e   :  { %1357 = vmax.xlane.f32.xlu1 %v1356_v13 }
 0x6a2   :  { %1360 = vmax.xlane.f32.xlu1 %v1359_v15 }
 0x722   :  { %v1355_v22 = vpop.xlane.xlu1 %1354 }
 0x723   :  { %v1363_v23 = vsub.f32 %v1256_v1, %v1355_v22  ;;  %v169_v22 = vld [vmem:[#allocation2 + $0x68] sm:$0xff] }
 0x725   :  { %v1368_v25 = vmul.f32 1.442695, %v1363_v23  ;;  %v168_v23 = vld [vmem:[#allocation2 + $0x60] sm:$0xff] }
 0x726   :  { %v1352_v26 = vpop.xlane.xlu1 %1351 }
 0x727   :  { %3243 = vpow2.f32 %v1368_v25  ;;  %v1362_v27 = vsub.f32 %v1251_v3, %v1352_v26 }
 0x729   :  { %v1366_v28 = vmul.f32 1.442695, %v1362_v27 }
 0x72b   :  { %3245 = vpow2.f32 %v1366_v28  ;;  %v1358_v29 = vpop.xlane.xlu1 %1357 }
 0x72c   :  { %v1364_v30 = vsub.f32 %v1342_v10, %v1358_v29 }
 0x72e   :  { %v1370_v31 = vmul.f32 1.442695, %v1364_v30 }
 0x72f   :  { %v1361_v32 = vpop.xlane.xlu1 %1360 }
 0x730   :  { %3247 = vpow2.f32 %v1370_v31  ;;  %v1365_v33 = vsub.f32 %v1347_v11, %v1361_v32 }
 0x731   :  { %v3590_v34 = vpop.eup %3243 }
 0x732   :  { %v1372_v35 = vmul.f32 1.442695, %v1365_v33  ;;  %v1377_v36 = vsel %vm355_vm3, %v3590_v34, 0.0 }
 0x733   :  { %1378 = vadd.xlane.f32.xlu1 %v1377_v36  ;;  %v171_v36 = vld [vmem:[#allocation2 + $0x78] sm:$0xff] }
 0x734   :  { %3249 = vpow2.f32 %v1372_v35 }
 0x735   :  { %v3246_v37 = vpop.eup %3245 }
 0x736   :  { %v1374_v38 = vsel %vm355_vm3, %v3246_v37, 0.0 }
 0x737   :  { %1375 = vadd.xlane.f32.xlu1 %v1374_v38 }
 0x73a   :  { %v3248_v39 = vpop.eup %3247 }
 0x73b   :  { %v1380_v40 = vsel %vm355_vm3, %v3248_v39, 0.0 }
 0x73c   :  { %1381 = vadd.xlane.f32.xlu0 %v1380_v40 }
 0x73e   :  { %v3596_v45 = vpop.eup %3249 }
 0x73f   :  { %v1383_v46 = vsel %vm355_vm3, %v3596_v45, 0.0 }
 0x740   :  { %1384 = vadd.xlane.f32.xlu1 %v1383_v46 }
 0x751   :  { %3172 = vrot.lane.b32.xlu1 %v3455_v16, %s3361_s16 }
 0x752   :  { %3187 = vrot.lane.b32.xlu0 %v3465_v20, %s3362_s17 }
 0x755   :  { %3177 = vrot.lane.b32.xlu1 %v3465_v20, %s3361_s16 }
 0x759   :  { %3182 = vrot.lane.b32.xlu1 %v3455_v16, %s3362_s17 }
 0x75d   :  { %1669 = vrot.lane.b32.xlu1 %v3449_v14, %s3363_s18 }
 0x761   :  { %1671 = vrot.lane.b32.xlu1 %v3447_v12, %s3363_s18 }
 0x763   :  { %v2850_v47 = vpop.f32.mrb[4].mxu0 }
 0x764   :  { %v878_v48 = vpop.f32.mrb[5].mxu0 }
 0x765   :  { %1760 = vrot.lane.b32.xlu1 %v3459_v19, %s3363_s18  ;;  %2860 = vmatprep.mubr.msk.f32.mxu0 %vm182_vm1, %v878_v48 }
 0x766   :  { %2861 = vmatmul.mubr.msk.f32.vlgmr.msra.gmra.mrb[6].mxu0 %vm182_vm1, %v2850_v47 }
 0x767   :  { %2863 = vmatprep.mubr.msk.f32.mxu0 %vm182_vm1, %v3570_v59  ;;  %2867 = vmatpush3.msra.mxu0 %v3587_v21 }
 0x769   :  { %1762 = vrot.lane.b32.xlu1 %v3457_v17, %s3363_s18 }
 0x76a   :  { %2864 = vmatmul.mubr.msk.f32.gmra.mrb[8].mxu0 %vm182_vm1, %v3568_v58 }
 0x76b   :  { %2868 = vmatprep.mubr.msk.f32.mxu0 %vm182_vm1, %v3529_v42 }
 0x76e   :  { %2869 = vmatmul.mubr.msk.f32.vlgmr.msra.gmra.mrb[6].mxu0 %vm182_vm1, %v3527_v41 }
 0x76f   :  { %2871 = vmatprep.mubr.msk.f32.mxu0 %vm182_vm1, %v3533_v44 }
 0x772   :  { %2872 = vmatmul.mubr.msk.f32.gmra.mrb[8].mxu0 %vm182_vm1, %v3531_v43 }
 0x7c0   :  { %v1379_v12 = vpop.xlane.xlu1 %1378 }
 0x7c4   :  { %v1376_v14 = vpop.xlane.xlu1 %1375 }
 0x7c5   :  { %3251 = vrcp.f32 %v1376_v14 }
 0x7c9   :  { %v1382_v19 = vpop.xlane.xlu0 %1381 }
 0x7ca   :  { %3253 = vrcp.f32 %v1382_v19 }
 0x7cb   :  { %3255 = vrcp.f32 %v1379_v12 }
 0x7cd   :  { %v1385_v17 = vpop.xlane.xlu1 %1384  ;;  %v3188_v41 = vpop.permute.xlu0 %3187 }
 0x7ce   :  { %3257 = vrcp.f32 %v1385_v17  ;;  %v3190_v57 = vunpack.i.h.bf16 %v3188_v41  ;;  %v3189_v58 = vunpack.i.l.bf16 %v3188_v41 }
 0x7cf   :  { %v3252_v49 = vpop.eup %3251 }
 0x7d0   :  { %v1390_v50 = vmul.f32 %v3252_v49, %v3246_v37  ;;  %v3056_v1 = vpack.c.bf16 %v3190_v57, %v3189_v58  ;;  %v170_v37 = vld [vmem:[#allocation2 + $0x70] sm:$0xff] }
 0x7d1   :  { %v3173_v42 = vpop.permute.xlu1 %3172 }
 0x7d2   :  { %v3175_v51 = vunpack.i.h.bf16 %v3173_v42  ;;  %v3174_v52 = vunpack.i.l.bf16 %v3173_v42  ;;  %2892 = vmatprep.mubr.msk.f32.mxu0 %vm355_vm3, %v1390_v50 }
 0x7d4   :  { %v3254_v44 = vpop.eup %3253  ;;  %v3042_v53 = vpack.c.bf16 %v3175_v51, %v3174_v52 }
 0x7d5   :  { %v3256_v54 = vpop.eup %3255  ;;  %v3178_v43 = vpop.permute.xlu1 %3177  ;;  %v1392_v55 = vmul.f32 %v3254_v44, %v3248_v39 }
 0x7d6   :  { %v3180_v59 = vunpack.i.h.bf16 %v3178_v43  ;;  %v3179_v60 = vunpack.i.l.bf16 %v3178_v43  ;;  %3043 = vmatprep.subr.bf16.mxu0 %v3042_v53  ;;  %v1391_v61 = vmul.f32 %v3256_v54, %v3590_v34 }
 0x7d7   :  { %3045 = vmatpush3.bf16.msra.mxu0 %v3042_v53  ;;  %2899 = vmatprep.mubr.msk.f32.mxu1 %vm355_vm3, %v1392_v55 }
 0x7d8   :  { %v3046_v62 = vpack.c.bf16 %v3180_v59, %v3179_v60  ;;  %2902 = vmatprep.subr.mxu0 %v3627_v56  ;;  %v3258_v63 = vpop.eup %3257 }
 0x7d9   :  { %v3183_v0 = vpop.permute.xlu1 %3182  ;;  %v1393_v4 = vmul.f32 %v3258_v63, %v3596_v45 }
 0x7da   :  { %v3185_v2 = vunpack.i.h.bf16 %v3183_v0  ;;  %v3184_v3 = vunpack.i.l.bf16 %v3183_v0  ;;  %2893 = vmatmul.mubr.msk.f32.vlgmr.msra.gmra.mrb[10].mxu0 %vm355_vm3, %v1391_v61  ;;  %3047 = vmatprep.subr.bf16.mxu1 %v3046_v62 }
 0x7db   :  { %3049 = vmatpush3.bf16.msra.mxu1 %v3046_v62  ;;  %2903 = vmatpush3.msra.mxu0 %v3627_v56 }
 0x7dc   :  { %v3050_v5 = vpack.c.bf16 %v3185_v2, %v3184_v3  ;;  %3058 = vmatprep.subr.msk.bf16.mxu0 %vm3473_vm2, %v3056_v1 }
 0x7dd   :  { %v1670_v6 = vpop.permute.xlu1 %1669 }
 0x7de   :  { %2900 = vmatmul.mubr.msk.f32.vlgmr.msra.gmra.mrb[18].mxu1 %vm355_vm3, %v1393_v4  ;;  %3052 = vmatprep.subr.msk.bf16.mxu1 %vm3473_vm2, %v3050_v5 }
 0x7df   :  { %2914 = vmatprep.mubr.msk.f32.mxu1 %vm182_vm1, %v1670_v6 }
 0x7e1   :  { %v1672_v7 = vpop.permute.xlu1 %1671 }
 0x7e4   :  { %3055 = vmatpush3.bf16.xpose.msk.msra.mxu1 %vm3473_vm2, %v3050_v5 }
 0x7e5   :  { %v1761_v10 = vpop.permute.xlu1 %1760 }
 0x7e9   :  { %v1763_v15 = vpop.permute.xlu1 %1762 }
 0x7eb   :  { %2915 = vmatmul.mubr.msk.f32.vlgmr.msra.gmra.mrb[20].mxu1 %vm182_vm1, %v1672_v7 }
 0x8ad   :  { %v2894_v8 = vpop.f32.mrb[10].mxu0 }
 0x8ae   :  { %v1472_v9 = vpop.f32.mrb[11].mxu0 }
 0x8af   :  { %2904 = vmatprep.mubr.msk.f32.mxu0 %vm182_vm1, %v1472_v9  ;;  %v175_v9 = vld [vmem:[%s3793_s3 + $0x18] sm:$0xff] }
 0x8b0   :  { %2905 = vmatmul.mubr.msk.f32.vlgmr.msra.gmra.mrb[6].mxu0 %vm182_vm1, %v2894_v8 }
 0x8b1   :  { %3061 = vmatpush3.bf16.xpose.msk.msra.mxu0 %vm3473_vm2, %v3056_v1  ;;  %v2901_v11 = vpop.f32.mrb[18].mxu1 }
 0x8b2   :  { %v1559_v13 = vpop.f32.mrb[19].mxu1 }
 0x8b3   :  { %2907 = vmatprep.mubr.msk.f32.mxu0 %vm182_vm1, %v1559_v13 }
 0x8b4   :  { %2908 = vmatmul.mubr.msk.f32.gmra.mrb[8].mxu0 %vm182_vm1, %v2901_v11 }
 0x8b5   :  { %2921 = vmatprep.mubr.msk.f32.mxu0 %vm182_vm1, %v1761_v10 }
 0x8b8   :  { %2922 = vmatmul.mubr.msk.f32.vlgmr.msra.gmra.mrb[12].mxu0 %vm182_vm1, %v1763_v15 }
 0x8be   :  { %v2916_v25 = vpop.f32.mrb[20].mxu1 }
 0x8bf   :  { %v1757_v26 = vadd.f32 %v2916_v25, %v169_v22  ;;  %v1751_v27 = vpop.f32.mrb[21].mxu1  ;;  %v2661_v22 = vld [vmem:[%s3795_s5 + $0x2] ss:$0 sm:$0xff] }
 0x8c0   :  { %v1752_v28 = vadd.f32 %v1751_v27, %v168_v23 }
 0x8c1   :  { %v1854_v24 = vsel %vm355_vm3, %v1757_v26, -inf }
 0x8c2   :  { %1855 = vmax.xlane.f32.xlu0 %v1854_v24  ;;  %v1851_v29 = vsel %vm355_vm3, %v1752_v28, -inf }
 0x8c3   :  { %1852 = vmax.xlane.f32.xlu1 %v1851_v29 }
 0x94f   :  { %v1856_v30 = vpop.xlane.xlu0 %1855 }
 0x950   :  { %v1853_v31 = vpop.xlane.xlu1 %1852  ;;  %v1864_v32 = vsub.f32 %v1757_v26, %v1856_v30  ;;  %v3300_v30 = vld [vmem:[%s3790_s0] sm:$0xff] }
 0x951   :  { %v1863_v33 = vsub.f32 %v1752_v28, %v1853_v31  ;;  %v3299_v28 = vld [vmem:[%s3790_s0 + $0x8] sm:$0xff] }
 0x952   :  { %v1869_v34 = vmul.f32 1.442695, %v1864_v32 }
 0x953   :  { %v1867_v35 = vmul.f32 1.442695, %v1863_v33 }
 0x954   :  { %3259 = vpow2.f32 %v1869_v34 }
 0x955   :  { %3261 = vpow2.f32 %v1867_v35 }
 0x95e   :  { %v3260_v47 = vpop.eup %3259 }
 0x95f   :  { %v3262_v12 = vpop.eup %3261  ;;  %v1878_v14 = vsel %vm355_vm3, %v3260_v47, 0.0 }
 0x960   :  { %v1875_v19 = vsel %vm355_vm3, %v3262_v12, 0.0 }
 0x98b   :  { %v2923_v38 = vpop.f32.mrb[12].mxu0 }
 0x98c   :  { %v1848_v39 = vadd.f32 %v2923_v38, %v171_v36  ;;  %v1842_v40 = vpop.f32.mrb[13].mxu0 }
 0x98d   :  { %v1843_v45 = vadd.f32 %v1842_v40, %v170_v37  ;;  %v3301_v37 = vld [vmem:[%s3790_s0 + $0x18] sm:$0xff] }
 0x98e   :  { %v1860_v46 = vsel %vm355_vm3, %v1848_v39, -inf }
 0x98f   :  { %1861 = vmax.xlane.f32.xlu1 %v1860_v46  ;;  %v1857_v48 = vsel %vm355_vm3, %v1843_v45, -inf }
 0x990   :  { %1858 = vmax.xlane.f32.xlu0 %v1857_v48 }
 0x993   :  { %1879 = vadd.xlane.f32.xlu1 %v1878_v14 }
 0x994   :  { %1876 = vadd.xlane.f32.xlu0 %v1875_v19 }
 0xa1c   :  { %v1862_v17 = vpop.xlane.xlu1 %1861 }
 0xa1d   :  { %v1866_v49 = vsub.f32 %v1848_v39, %v1862_v17  ;;  %v1859_v50 = vpop.xlane.xlu0 %1858  ;;  %v3302_v39 = vld [vmem:[%s3790_s0 + $0x10] sm:$0xff] }
 0xa1e   :  { %v1865_v42 = vsub.f32 %v1843_v45, %v1859_v50 }
 0xa1f   :  { %v1873_v51 = vmul.f32 1.442695, %v1866_v49 }
 0xa20   :  { %v1871_v52 = vmul.f32 1.442695, %v1865_v42  ;;  %v1880_v58 = vpop.xlane.xlu1 %1879 }
 0xa21   :  { %3263 = vpow2.f32 %v1873_v51  ;;  %v1877_v41 = vpop.xlane.xlu0 %1876 }
 0xa22   :  { %3265 = vpow2.f32 %v1871_v52 }
 0xa23   :  { %3267 = vrcp.f32 %v1877_v41 }
 0xa24   :  { %3269 = vrcp.f32 %v1880_v58 }
 0xa2b   :  { %v3264_v44 = vpop.eup %3263 }
 0xa2c   :  { %v3266_v53 = vpop.eup %3265  ;;  %v1884_v54 = vsel %vm355_vm3, %v3264_v44, 0.0 }
 0xa2d   :  { %1885 = vadd.xlane.f32.xlu1 %v1884_v54  ;;  %v1881_v43 = vsel %vm355_vm3, %v3266_v53, 0.0  ;;  %v3268_v55 = vpop.eup %3267 }
 0xa2e   :  { %1882 = vadd.xlane.f32.xlu0 %v1881_v43  ;;  %v1891_v57 = vmul.f32 %v3268_v55, %v3262_v12  ;;  %v3270_v5 = vpop.eup %3269 }
 0xa2f   :  { %v1892_v6 = vmul.f32 %v3270_v5, %v3260_v47 }
 0xa30   :  { %2928 = vmatprep.mubr.msk.f32.mxu1 %vm355_vm3, %v1891_v57 }
 0xa3e   :  { %3197 = vrot.lane.b32.xlu1 %v3465_v20, %s3364_s20 }
 0xa44   :  { %3192 = vrot.lane.b32.xlu0 %v3455_v16, %s3364_s20 }
 0xaba   :  { %v1886_v59 = vpop.xlane.xlu1 %1885 }
 0xabb   :  { %3271 = vrcp.f32 %v1886_v59  ;;  %v1883_v60 = vpop.xlane.xlu0 %1882 }
 0xabc   :  { %3273 = vrcp.f32 %v1883_v60  ;;  %v3206_v60 = vpack.i.bf16 %v175_v9, %v3627_v56 }
 0xabe   :  { %v3198_v61 = vpop.permute.xlu1 %3197 }
 0xabf   :  { %v3200_v62 = vunpack.i.h.bf16 %v3198_v61  ;;  %v3199_v63 = vunpack.i.l.bf16 %v3198_v61  ;;  %v3193_v0 = vpop.permute.xlu0 %3192  ;;  %v3201_v61 = vpack.i.bf16 %v3580_v18, %v3587_v21 }
 0xac0   :  { %v3195_v1 = vunpack.i.h.bf16 %v3193_v0  ;;  %v3194_v2 = vunpack.i.l.bf16 %v3193_v0 }
 0xac1   :  { %v3066_v3 = vpack.c.bf16 %v3200_v62, %v3199_v63 }
 0xac2   :  { %v3062_v4 = vpack.c.bf16 %v3195_v1, %v3194_v2 }
 0xac3   :  { %3067 = vmatprep.subr.bf16.mxu0 %v3066_v3 }
 0xac4   :  { %3063 = vmatprep.subr.bf16.mxu1 %v3062_v4  ;;  %3069 = vmatpush3.bf16.msra.mxu0 %v3066_v3 }
 0xac5   :  { %v3272_v20 = vpop.eup %3271  ;;  %3065 = vmatpush3.bf16.msra.mxu1 %v3062_v4  ;;  %2938 = vmatprep.subr.mxu0 %v175_v9 }
 0xac6   :  { %v3274_v16 = vpop.eup %3273  ;;  %v1894_v8 = vmul.f32 %v3272_v20, %v3264_v44 }
 0xac7   :  { %v1893_v7 = vmul.f32 %v3274_v16, %v3266_v53 }
 0xac8   :  { %2929 = vmatmul.mubr.msk.f32.vlgmr.msra.gmra.mrb[22].mxu1 %vm355_vm3, %v1892_v6 }
 0xac9   :  { %2935 = vmatprep.mubr.msk.f32.mxu0 %vm355_vm3, %v1893_v7 }
 0xaca   :  { %2936 = vmatmul.mubr.msk.f32.vlgmr.msra.gmra.mrb[14].mxu0 %vm355_vm3, %v1894_v8 }
 0xacb   :  { %2939 = vmatpush3.msra.mxu0 %v175_v9 }
 0xb9b   :  { %v2930_v10 = vpop.f32.mrb[22].mxu1 }
 0xb9c   :  { %v1973_v11 = vpop.f32.mrb[23].mxu1 }
 0xb9d   :  { %v2937_v13 = vpop.f32.mrb[14].mxu0  ;;  %2940 = vmatprep.mubr.msk.f32.mxu0 %vm182_vm1, %v1973_v11 }
 0xb9e   :  { %v2060_v15 = vpop.f32.mrb[15].mxu0  ;;  %2941 = vmatmul.mubr.msk.f32.vlgmr.msra.gmra.mrb[6].mxu0 %vm182_vm1, %v2930_v10 }
 0xb9f   :  { %2943 = vmatprep.mubr.msk.f32.mxu0 %vm182_vm1, %v2060_v15 }
 0xba2   :  { %2944 = vmatmul.mubr.msk.f32.gmra.mrb[8].mxu0 %vm182_vm1, %v2937_v13 }
 0xc71   :  { %v2942_v23 = vpop.f32.mrb[6].mxu0 }
 0xc72   :  { %v2175_v25 = vadd.f32 %v2942_v23, %v2661_v22  ;;  %v2147_v26 = vpop.f32.mrb[7].mxu0 }
 0xc73   :  { %v2174_v27 = vadd.f32 %v2661_v22, %v2147_v26 }
 0xc74   :  { %v2179_v24 = vadd.f32 %v3299_v28, %v2175_v25 }
 0xc75   :  { %v2945_v29 = vpop.f32.mrb[8].mxu0  ;;  %v2178_v31 = vadd.f32 %v3300_v30, %v2174_v27  ;;  %v2663_v27 = vld [vmem:[%s3795_s5 + $0x5] ss:$0 sm:$0xff] }
 0xc76   :  { %v2177_v32 = vadd.f32 %v2945_v29, %v2661_v22  ;;  %v2157_v33 = vpop.f32.mrb[9].mxu0  ;;  %v2185_v34 = vsel %vm58_vm0, %v2179_v24, 0.0 }
 0xc77   :  { %v2176_v35 = vadd.f32 %v2661_v22, %v2157_v33  ;;  %2186 = vadd.xlane.f32.xlu0 %v2185_v34  ;;  %v2182_v36 = vsel %vm58_vm0, %v2178_v31, 0.0  ;;  %v2662_v22 = vld [vmem:[%s3795_s5 + $0x4] ss:$0 sm:$0xff] }
 0xc78   :  { %2183 = vadd.xlane.f32.xlu1 %v2182_v36  ;;  %v2181_v38 = vadd.f32 %v3301_v37, %v2177_v32 }
 0xc79   :  { %v2180_v40 = vadd.f32 %v3302_v39, %v2176_v35  ;;  %v2389_v39 = vld [vmem:[%s3794_s4] sm:$0xff] }
 0xc7a   :  { %v2191_v45 = vsel %vm58_vm0, %v2181_v38, 0.0 }
 0xc7b   :  { %v2188_v46 = vsel %vm58_vm0, %v2180_v40, 0.0 }
 0xc7c   :  { %2192 = vadd.xlane.f32.xlu1 %v2191_v45  ;;  %2189 = vadd.xlane.f32.xlu0 %v2188_v46  ;;  %v2391_v46 = vld [vmem:[%s3794_s4 + $0x10] sm:$0xff] }
 0xd04   :  { %v2187_v47 = vpop.xlane.xlu0 %2186 }
 0xd05   :  { %v2196_v48 = vmul.f32 0.03125, %v2187_v47  ;;  %v2184_v12 = vpop.xlane.xlu1 %2183  ;;  %v2392_v47 = vld [vmem:[%s3794_s4 + $0x18] sm:$0xff] }
 0xd06   :  { %v2195_v14 = vmul.f32 0.03125, %v2184_v12  ;;  %v2393_v12 = vld [vmem:[%s3794_s4 + $0x20] sm:$0xff] }
 0xd07   :  { %v2200_v19 = vsub.f32 %v2179_v24, %v2196_v48  ;;  %v3082_v48 = vpack.c.bf16 %v2392_v47, %v2391_v46 }
 0xd08   :  { %v2199_v17 = vsub.f32 %v2178_v31, %v2195_v14  ;;  %v2394_v14 = vld [vmem:[%s3794_s4 + $0x28] sm:$0xff] }
 0xd09   :  { %v2193_v49 = vpop.xlane.xlu1 %2192  ;;  %v2190_v50 = vpop.xlane.xlu0 %2189  ;;  %v2204_v42 = vmul.f32 %v2200_v19, %v2200_v19 }
 0xd0a   :  { %v2198_v51 = vmul.f32 0.03125, %v2193_v49  ;;  %v2197_v52 = vmul.f32 0.03125, %v2190_v50  ;;  %v2203_v41 = vmul.f32 %v2199_v17, %v2199_v17  ;;  %v2396_v49 = vld [vmem:[%s3794_s4 + $0x38] sm:$0xff] }
 0xd0b   :  { %v2210_v44 = vsel %vm58_vm0, %v2204_v42, 0.0  ;;  %v2664_v42 = vld [vmem:[%s3795_s5 + $0x1] ss:$0 sm:$0xff] }
 0xd0c   :  { %v2202_v53 = vsub.f32 %v2181_v38, %v2198_v51  ;;  %v2201_v54 = vsub.f32 %v2180_v40, %v2197_v52  ;;  %2211 = vadd.xlane.f32.xlu1 %v2210_v44  ;;  %v2207_v43 = vsel %vm58_vm0, %v2203_v41, 0.0  ;;  %v2390_v40 = vld [vmem:[%s3794_s4 + $0x8] sm:$0xff] }
 0xd0d   :  { %2208 = vadd.xlane.f32.xlu0 %v2207_v43  ;;  %v3078_v45 = vpack.c.bf16 %v2390_v40, %v2389_v39 }
 0xd0e   :  { %v2206_v55 = vmul.f32 %v2202_v53, %v2202_v53  ;;  %v2205_v57 = vmul.f32 %v2201_v54, %v2201_v54 }
 0xd0f   :  { %3079 = vmatprep.subr.bf16.mxu0 %v3078_v45 }
 0xd10   :  { %v2216_v58 = vsel %vm58_vm0, %v2206_v55, 0.0  ;;  %v2213_v59 = vsel %vm58_vm0, %v2205_v57, 0.0  ;;  %3081 = vmatpush3.bf16.msra.mxu0 %v3078_v45 }
 0xd11   :  { %2217 = vadd.xlane.f32.xlu1 %v2216_v58  ;;  %2214 = vadd.xlane.f32.xlu0 %v2213_v59 }
 0xd12   :  { %3083 = vmatprep.subr.bf16.mxu0 %v3082_v48 }
 0xd14   :  { %3085 = vmatpush3.bf16.msra.mxu0 %v3082_v48 }
 0xd22   :  { %3207 = vrot.lane.b32.xlu1 %v3206_v60, %s3354_s27 }
 0xd27   :  { %3202 = vrot.lane.b32.xlu0 %v3201_v61, %s3354_s27  ;;  %s3365_s27 = smov [#allocation5]  }
 0xd28   :  { %s2580_s10 = sshll.u32 %s3365_s27, 4  ;;  %s2581_s10 = int_to_ptr.vmem [resolvable:$true] %s2580_s10 }
 0xd29   :  { %p3330_p9 = scmp.lt.s32.totalorder %s2581_s10, %s2581_s10 }
 0xd99   :  { %v2212_v62 = vpop.xlane.xlu1 %2211 }
 0xd9a   :  { %v2220_v63 = vmul.f32 0.03125, %v2212_v62  ;;  %v2209_v0 = vpop.xlane.xlu0 %2208 }
 0xd9b   :  { %v2219_v1 = vmul.f32 0.03125, %v2209_v0 }
 0xd9c   :  { %v2224_v2 = vadd.f32 1e-05, %v2220_v63 }
 0xd9d   :  { %v2223_v3 = vadd.f32 1e-05, %v2219_v1 }
 0xd9e   :  { %3275 = vrsqrt.f32 %v2224_v2  ;;  %v2218_v4 = vpop.xlane.xlu1 %2217  ;;  %v2215_v5 = vpop.xlane.xlu0 %2214 }
 0xd9f   :  { %3277 = vrsqrt.f32 %v2223_v3  ;;  %v2222_v20 = vmul.f32 0.03125, %v2218_v4  ;;  %v2221_v16 = vmul.f32 0.03125, %v2215_v5 }
 0xda1   :  { %v2226_v56 = vadd.f32 1e-05, %v2222_v20  ;;  %v2225_v6 = vadd.f32 1e-05, %v2221_v16 }
 0xda2   :  { %v3203_v7 = vpop.permute.xlu0 %3202  ;;  %v3208_v8 = vpop.permute.xlu1 %3207 }
 0xda3   :  { %3279 = vrsqrt.f32 %v2226_v56  ;;  %v3205_v18 = vunpack.i.h.bf16 %v3203_v7  ;;  %v3204_v21 = vunpack.i.l.bf16 %v3203_v7  ;;  %v3210_v9 = vunpack.i.h.bf16 %v3208_v8 }
 0xda4   :  { %3281 = vrsqrt.f32 %v2225_v6  ;;  %v3209_v10 = vunpack.i.l.bf16 %v3208_v8 }
 0xda5   :  { %v3070_v11 = vpack.c.bf16 %v3205_v18, %v3204_v21  ;;  %v2669_v21 = vld [vmem:[%s3795_s5 + $0x3] ss:$0 sm:$0xff] }
 0xda6   :  { %v3074_v13 = vpack.c.bf16 %v3210_v9, %v3209_v10 }
 0xda7   :  { %3071 = vmatprep.subr.bf16.mxu1 %v3070_v11 }
 0xda8   :  { %v3276_v15 = vpop.eup %3275  ;;  %3073 = vmatpush3.bf16.msra.mxu1 %v3070_v11 }
 0xda9   :  { %v3278_v23 = vpop.eup %3277  ;;  %v2232_v25 = vmul.f32 %v3276_v15, %v2200_v19  ;;  %3075 = vmatprep.subr.bf16.mxu1 %v3074_v13  ;;  %v3086_v19 = vpack.c.bf16 %v2394_v14, %v2393_v12 }
 0xdaa   :  { %v2231_v26 = vmul.f32 %v3278_v23, %v2199_v17  ;;  %v2395_v17 = vld [vmem:[%s3794_s4 + $0x30] sm:$0xff] }
 0xdab   :  { %v2240_v28 = vmul.f32 %v2662_v22, %v2232_v25  ;;  %3087 = vmatprep.subr.bf16.mxu0 %v3086_v19  ;;  %v3090_v50 = vpack.c.bf16 %v2396_v49, %v2395_v17 }
 0xdac   :  { %3077 = vmatpush3.bf16.msra.mxu1 %v3074_v13  ;;  %v2239_v24 = vmul.f32 %v2662_v22, %v2231_v26  ;;  %3089 = vmatpush3.bf16.msra.mxu0 %v3086_v19 }
 0xdad   :  { %v3280_v29 = vpop.eup %3279  ;;  %v3709_v33 = vadd.f32 %v2663_v27, %v2240_v28  ;;  %3091 = vmatprep.subr.bf16.mxu0 %v3090_v50 }
 0xdae   :  { %v3282_v30 = vpop.eup %3281  ;;  %v3707_v31 = vadd.f32 %v2663_v27, %v2239_v24  ;;  %v2234_v32 = vmul.f32 %v3280_v29, %v2202_v53 }
 0xdaf   :  { %v2233_v34 = vmul.f32 %v3282_v30, %v2201_v54 }
 0xdb0   :  { %2954 = vmatprep.mubr.msk.f32.mxu1 %vm58_vm0, %v3707_v31  ;;  %v2242_v35 = vmul.f32 %v2662_v22, %v2234_v32  ;;  %3093 = vmatpush3.bf16.msra.mxu0 %v3090_v50 }
 0xdb1   :  { %2955 = vmatmul.mubr.msk.f32.vlgmr.msra.gmra.mrb[24].mxu1 %vm58_vm0, %v3709_v33  ;;  %v2241_v36 = vmul.f32 %v2662_v22, %v2233_v34 }
 0xdb2   :  { %v3715_v37 = vadd.f32 %v2663_v27, %v2242_v35 }
 0xdb3   :  { %v3717_v38 = vadd.f32 %v2663_v27, %v2241_v36 }
 0xdb5   :  { %2957 = vmatprep.mubr.msk.f32.mxu1 %vm58_vm0, %v3717_v38 }
 0xdb6   :  { %2958 = vmatmul.mubr.msk.f32.gmra.mrb[26].mxu1 %vm58_vm0, %v3715_v37 }
 0xe84   :  { %v2956_v51 = vpop.f32.mrb[24].mxu1 }
 0xe85   :  { %v2355_v52 = vadd.f32 %v2956_v51, %v2664_v42  ;;  %v2349_v41 = vpop.f32.mrb[25].mxu1 }
 0xe86   :  { %v2350_v44 = vadd.f32 %v2664_v42, %v2349_v41 }
 0xe87   :  { %v2374_v53 = vmul.f32 0.70710677, %v2355_v52  ;;  %v2369_v2 = vmul.f32 0.5, %v2355_v52 }
 0xe88   :  { %v2373_v54 = vmul.f32 0.70710677, %v2350_v44  ;;  %v2368_v0 = vmul.f32 0.5, %v2350_v44 }
 0xe89   :  { %3283 = verf.f32 %v2374_v53  ;;  %v2959_v43 = vpop.f32.mrb[26].mxu1 }
 0xe8a   :  { %3285 = verf.f32 %v2373_v54  ;;  %v2365_v55 = vadd.f32 %v2959_v43, %v2664_v42  ;;  %v2359_v57 = vpop.f32.mrb[27].mxu1 }
 0xe8b   :  { %v2360_v58 = vadd.f32 %v2664_v42, %v2359_v57 }
 0xe8c   :  { %v2376_v59 = vmul.f32 0.70710677, %v2365_v55  ;;  %v2371_v7 = vmul.f32 0.5, %v2365_v55 }
 0xe8d   :  { %v2375_v60 = vmul.f32 0.70710677, %v2360_v58  ;;  %v2370_v56 = vmul.f32 0.5, %v2360_v58 }
 0xe8e   :  { %3287 = verf.f32 %v2376_v59 }
 0xe8f   :  { %3289 = verf.f32 %v2375_v60 }
 0xe93   :  { %v3284_v61 = vpop.eup %3283 }
 0xe94   :  { %v3286_v62 = vpop.eup %3285  ;;  %v2382_v63 = vadd.f32 1.0, %v3284_v61 }
 0xe95   :  { %v2381_v1 = vadd.f32 1.0, %v3286_v62 }
 0xe96   :  { %v2386_v5 = vmul.f32 %v2382_v63, %v2369_v2  ;;  %v2674_v63 = vld [vmem:[%s3795_s5 + $0x6] ss:$0 sm:$0xff] }
 0xe97   :  { %v2385_v3 = vmul.f32 %v2381_v1, %v2368_v0 }
 0xe98   :  { %v3288_v4 = vpop.eup %3287 }
 0xe99   :  { %v3290_v20 = vpop.eup %3289  ;;  %v2384_v16 = vadd.f32 1.0, %v3288_v4  ;;  %2976 = vmatprep.mubr.msk.f32.mxu0 %vm2401_vm4, %v2385_v3  ;;  %v2675_v3 = vld [vmem:[%s3795_s5 + $0x7] ss:$0 sm:$0xff]  ;;  %s3325_s5 = scalar_lea.vmem %s2581_s10, 512 }
 0xe9a   :  { %v2383_v6 = vadd.f32 1.0, %v3290_v20  ;;  %2977 = vmatmul.mubr.msk.f32.vlgmr.msra.gmra.mrb[16].mxu0 %vm2401_vm4, %v2386_v5  ;;  %p3326_p8 = scmp.ne.s32.totalorder %s2581_s10, %s3325_s5  ;;  %p3331_p10 = scmp.lt.s32.totalorder %s3325_s5, %s3325_s5 }
 0xe9b   :  { %v2388_v18 = vmul.f32 %v2384_v16, %v2371_v7 }
 0xe9c   :  { %v2387_v8 = vmul.f32 %v2383_v6, %v2370_v56  ;;  %p3332_p11 = por %p3331_p10, %p3330_p9 }
 0xe9e   :  { %2979 = vmatprep.mubr.msk.f32.mxu0 %vm2401_vm4, %v2387_v8  ;;  %p3333_p12 = pnand %p3332_p11, %p3326_p8 }
 0xe9f   :  { %2980 = vmatmul.mubr.msk.f32.gmra.mrb[18].mxu0 %vm2401_vm4, %v2388_v18 }
 0xf6d   :  { %v2978_v9 = vpop.f32.mrb[16].mxu0 }
 0xf6e   :  { %v2486_v10 = vadd.f32 %v2978_v9, %v2669_v21  ;;  %v2480_v11 = vpop.f32.mrb[17].mxu0 }
 0xf6f   :  { %v2481_v13 = vadd.f32 %v2669_v21, %v2480_v11 }
 0xf70   :  { %v2500_v15 = vadd.f32 %v2486_v10, %v3709_v33 }
 0xf71   :  { %v2499_v22 = vadd.f32 %v2481_v13, %v3707_v31 }
 0xf72   :  { %v2981_v23 = vpop.f32.mrb[18].mxu0  ;;  %v2506_v25 = vsel %vm58_vm0, %v2500_v15, 0.0 }
 0xf73   :  { %v2496_v26 = vadd.f32 %v2981_v23, %v2669_v21  ;;  %v2490_v27 = vpop.f32.mrb[19].mxu0  ;;  %2507 = vadd.xlane.f32.xlu0 %v2506_v25  ;;  %v2503_v28 = vsel %vm58_vm0, %v2499_v22, 0.0 }
 0xf74   :  { %v2491_v24 = vadd.f32 %v2669_v21, %v2490_v27  ;;  %2504 = vadd.xlane.f32.xlu1 %v2503_v28 }
 0xf75   :  { %v2502_v29 = vadd.f32 %v2496_v26, %v3715_v37 }
 0xf76   :  { %v2501_v30 = vadd.f32 %v2491_v24, %v3717_v38 }
 0xf77   :  { %v2512_v32 = vsel %vm58_vm0, %v2502_v29, 0.0 }
 0xf78   :  { %v2509_v33 = vsel %vm58_vm0, %v2501_v30, 0.0  ;;  %2513 = vadd.xlane.f32.xlu1 %v2512_v32 }
 0xf79   :  { %2510 = vadd.xlane.f32.xlu0 %v2509_v33 }
0x1000   :  { %v2508_v31 = vpop.xlane.xlu0 %2507 }
0x1001   :  { %v2516_v34 = vmul.f32 0.03125, %v2508_v31  ;;  %v2505_v35 = vpop.xlane.xlu1 %2504 }
0x1002   :  { %v2515_v36 = vmul.f32 0.03125, %v2505_v35 }
0x1003   :  { %v2520_v39 = vsub.f32 %v2500_v15, %v2516_v34 }
0x1004   :  { %v2519_v40 = vsub.f32 %v2499_v22, %v2515_v36 }
0x1005   :  { %v2514_v45 = vpop.xlane.xlu1 %2513  ;;  %v2524_v46 = vmul.f32 %v2520_v39, %v2520_v39 }
0x1006   :  { %v2511_v47 = vpop.xlane.xlu0 %2510  ;;  %v2518_v48 = vmul.f32 0.03125, %v2514_v45  ;;  %v2523_v12 = vmul.f32 %v2519_v40, %v2519_v40 }
0x1007   :  { %v2517_v37 = vmul.f32 0.03125, %v2511_v47  ;;  %v2530_v38 = vsel %vm58_vm0, %v2524_v46, 0.0 }
0x1008   :  { %v2522_v14 = vsub.f32 %v2502_v29, %v2518_v48  ;;  %2531 = vadd.xlane.f32.xlu1 %v2530_v38  ;;  %v2527_v19 = vsel %vm58_vm0, %v2523_v12, 0.0 }
0x1009   :  { %v2521_v17 = vsub.f32 %v2501_v30, %v2517_v37  ;;  %2528 = vadd.xlane.f32.xlu0 %v2527_v19 }
0x100a   :  { %v2526_v49 = vmul.f32 %v2522_v14, %v2522_v14 }
0x100b   :  { %v2525_v50 = vmul.f32 %v2521_v17, %v2521_v17 }
0x100c   :  { %v2536_v42 = vsel %vm58_vm0, %v2526_v49, 0.0 }
0x100d   :  { %v2533_v51 = vsel %vm58_vm0, %v2525_v50, 0.0  ;;  %2537 = vadd.xlane.f32.xlu1 %v2536_v42 }
0x100e   :  { %2534 = vadd.xlane.f32.xlu0 %v2533_v51 }
0x1095   :  { %v2532_v52 = vpop.xlane.xlu1 %2531 }
0x1096   :  { %v2540_v41 = vmul.f32 0.03125, %v2532_v52  ;;  %v2529_v44 = vpop.xlane.xlu0 %2528 }
0x1097   :  { %v2539_v53 = vmul.f32 0.03125, %v2529_v44 }
0x1098   :  { %v2544_v54 = vadd.f32 1e-05, %v2540_v41 }
0x1099   :  { %v2543_v43 = vadd.f32 1e-05, %v2539_v53 }
0x109a   :  { %3291 = vrsqrt.f32 %v2544_v54  ;;  %v2538_v55 = vpop.xlane.xlu1 %2537 }
0x109b   :  { %3293 = vrsqrt.f32 %v2543_v43  ;;  %v2535_v57 = vpop.xlane.xlu0 %2534  ;;  %v2542_v58 = vmul.f32 0.03125, %v2538_v55 }
0x109c   :  { %v2541_v59 = vmul.f32 0.03125, %v2535_v57 }
0x109d   :  { %v2546_v60 = vadd.f32 1e-05, %v2542_v58 }
0x109e   :  { %v2545_v61 = vadd.f32 1e-05, %v2541_v59 }
0x109f   :  { %3295 = vrsqrt.f32 %v2546_v60 }
0x10a0   :  { %3297 = vrsqrt.f32 %v2545_v61 }
0x10a4   :  { %v3292_v62 = vpop.eup %3291 }
0x10a5   :  { %v3294_v0 = vpop.eup %3293  ;;  %v2552_v1 = vmul.f32 %v3292_v62, %v2520_v39 }
0x10a6   :  { %v2551_v2 = vmul.f32 %v3294_v0, %v2519_v40 }
0x10a7   :  { %v2560_v4 = vmul.f32 %v2674_v63, %v2552_v1 }
0x10a8   :  { %v2559_v5 = vmul.f32 %v2674_v63, %v2551_v2 }
0x10a9   :  { %v3296_v20 = vpop.eup %3295  ;;  %v2568_v16 = vadd.f32 %v2675_v3, %v2560_v4 }
0x10aa   :  { %v3298_v56 = vpop.eup %3297  ;;  %v2554_v6 = vmul.f32 %v3296_v20, %v2522_v14  ;;  %v2567_v7 = vadd.f32 %v2675_v3, %v2559_v5 }
0x10ab   :  { %v2553_v8 = vmul.f32 %v3298_v56, %v2521_v17  ;;  %2572 = vst.msk [vmem:[#allocation5 + $0x8] sm:$0xff] %vm58_vm0, %v2568_v16 }
0x10ac   :  { %v2562_v18 = vmul.f32 %v2674_v63, %v2554_v6  ;;  %2571 = vst.msk [vmem:[#allocation5] sm:$0xff] %vm58_vm0, %v2567_v7 }
0x10ad   :  { %v2561_v21 = vmul.f32 %v2674_v63, %v2553_v8 }
0x10ae   :  { %v2570_v9 = vadd.f32 %v2675_v3, %v2562_v18 }
0x10af   :  { %v2569_v10 = vadd.f32 %v2675_v3, %v2561_v21 }
0x10b0   :  { %2574 = vst.msk [vmem:[#allocation5 + $0x18] sm:$0xff] %vm58_vm0, %v2570_v9 }
0x10b1   :  { %2573 = vst.msk [vmem:[#allocation5 + $0x10] sm:$0xff] %vm58_vm0, %v2569_v10 }
0x10b2   :  { %3336 = shalt.err (!%p3333_p12)
}
0x10b3   :  { %s3337_s13 = scalar_lea.hbm %s3796_s6, 512 }
0x10b4   :  { %p3338_p13 = scmp.ne.s32.totalorder %s3796_s6, %s3337_s13  ;;  %p3341_p0 = scmp.lt.u32.totalorder %s3337_s13, %s3796_s6 }
0x10b6   :  { %p3343_p1 = pnand %p3341_p0, %p3338_p13 }
0x10b8   :  { %3346 = shalt.err (!%p3343_p1)
}
0x10b9   :  { %2586 = dma.vmem_to_hbm [thread:$0]  %s2581_s10, 512, %s3796_s6, [#allocation4], %s3352_s7, %s3352_s7, %s3353_s8  }
0x10ba   :  { %3349 = dma.done.wait [#allocation4], 512  }
0x10bb   :  { %3350 = vsyncadd [#allocation4], 4294966784 }
0x10bc   :  { %2590 = vsyncpa [#allocation3], 1 }
0x10bd   :  { %2591 = vsyncpa [#allocation4], 1 }

</bundles_post_ra>
